<compile_context>
chip_gen: v7x
topology: tpu7x:2x2x1
jax: 0.10.0
libtpu: 0.0.40
codegen_flags: <defaults>
</compile_context>

<pallas_src>
import functools
import math

import jax
import jax.numpy as jnp
from jax.experimental import pallas as pl
from jax.experimental.pallas import tpu as pltpu


def _layer_norm(x, gamma, beta, eps=1e-6):
    mu = jnp.mean(x, axis=-1, keepdims=True)
    var = jnp.mean((x - mu) ** 2, axis=-1, keepdims=True)
    return (x - mu) * jax.lax.rsqrt(var + eps) * gamma + beta


def encoder_layer_kernel(
    x_ref,                   # (1, S, H)   full sequence block (resident across qi)
    wq_ref,                  # (H, H)      pre-transposed, pre-scaled by 1/sqrt(hd)
    wkv_ref,                 # (H, 2H)     [wk.T | wv.T] fused
    wd3_ref, bd_ref,         # (nh, hd, H), (1, H)
    g1_ref, be1_ref,         # (1, H), (1, H)   layer_norm 1
    w1_ref, b1_ref,          # (H, I), (1, I)
    w2_ref, b2_ref,          # (I, H), (1, H)
    g2_ref, be2_ref,         # (1, H), (1, H)   layer_norm 2
    o_ref,                   # (1, TQ, H)
    k_sc, v_sc,              # VMEM scratch: (nh, hd, S) K^T cache, (nh, S, hd) V cache
    *, num_heads, tq, compute_dtype,
):
    S, H = x_ref.shape[1], x_ref.shape[2]
    hd = H // num_heads
    qi = pl.program_id(1)

    # --- fused K/V projection: once per batch element, cached head-major in scratch ---
    @pl.when(qi == 0)
    def _():
        x_full = x_ref[0].astype(compute_dtype)                              # (S, H)
        kv = jnp.dot(x_full, wkv_ref[...],
                     preferred_element_type=jnp.float32)                     # (S, 2H) f32 acc
        # K^T head-major: one bulk 2-D transpose, then split the leading dim -> (nh, hd, S).
        k_sc[...] = kv[:, :H].T.reshape(num_heads, hd, S).astype(compute_dtype)
        # V head-major: split lane dim, swap leading axes -> (nh, S, hd).
        v_sc[...] = kv[:, H:].reshape(S, num_heads, hd).transpose(1, 0, 2).astype(compute_dtype)

    # --- query tile sliced from the already-resident full-sequence block ---
    start = pl.multiple_of(qi * tq, tq)
    x_tile = x_ref[0, pl.ds(start, tq), :].astype(jnp.float32)               # (TQ, H) residual, f32
    xc = x_tile.astype(compute_dtype)

    # --- Q projection (1/sqrt(hd) folded into wq), head-major in one reshape+transpose ---
    q = jnp.dot(xc, wq_ref[...], preferred_element_type=jnp.float32)         # (TQ, H)
    q3 = q.reshape(tq, num_heads, hd).transpose(1, 0, 2).astype(compute_dtype)  # (nh, TQ, hd)

    # --- batched-head attention, late (flash-style) softmax normalization ---
    s = jnp.einsum("hqd,hdk->hqk", q3, k_sc[...],
                   preferred_element_type=jnp.float32)                       # (nh, TQ, S)
    s = s - jnp.max(s, axis=-1, keepdims=True)                               # stable softmax
    p = jnp.exp(s)                                                           # unnormalized
    l = jnp.sum(p, axis=-1, keepdims=True)                                   # (nh, TQ, 1)
    ctx3 = jnp.einsum("hqk,hkd->hqd", p.astype(compute_dtype), v_sc[...],
                      preferred_element_type=jnp.float32)                    # (nh, TQ, hd)
    ctx3 = ctx3 * pl.reciprocal(l, approx=True)                              # rescale over hd only

    # --- output projection: contract heads directly (no concatenate / lane shuffle) ---
    per_head = jnp.einsum("hqd,hdo->hqo", ctx3.astype(compute_dtype), wd3_ref[...],
                          preferred_element_type=jnp.float32)                # (nh, TQ, H)
    attn_out = jnp.sum(per_head, axis=0) + bd_ref[...]

    h1n = _layer_norm(attn_out + x_tile, g1_ref[...], be1_ref[...])

    # --- position-wise feed-forward (ReLU) + residual + LayerNorm ---
    f = jnp.dot(h1n.astype(compute_dtype), w1_ref[...],
                preferred_element_type=jnp.float32) + b1_ref[...]
    f = jnp.maximum(f, 0.0)
    f2 = jnp.dot(f.astype(compute_dtype), w2_ref[...],
                 preferred_element_type=jnp.float32) + b2_ref[...]
    o_ref[0] = _layer_norm(f2 + h1n, g2_ref[...], be2_ref[...]).astype(o_ref.dtype)


def prepare_encoder_params(params, num_heads, compute_dtype=jnp.float32):
    """One-time host-side weight prep (at parameter-load time, NOT per forward):
    transpose nn.Linear weights to (in, out), fuse K|V, fold 1/sqrt(head_dim) into Wq,
    reshape Wd to (nh, hd, H) for direct head contraction, reshape biases / LN params
    to (1, dim), cast matmul weights to compute_dtype (bf16 is fine on all generations:
    elementwise math stays f32)."""
    H = params["wq"].shape[1]
    I = params["w1"].shape[0]
    hd = H // num_heads
    scale = 1.0 / math.sqrt(hd)
    f32 = jnp.float32
    return {
        "wq": (params["wq"].T * scale).astype(compute_dtype),
        "wkv": jnp.concatenate([params["wk"].T, params["wv"].T], axis=1).astype(compute_dtype),
        "wd3": params["wd"].T.reshape(num_heads, hd, H).astype(compute_dtype),
        "bd": params["bd"].reshape(1, H).astype(f32),
        "g1": params["ln1_g"].reshape(1, H).astype(f32),
        "be1": params["ln1_b"].reshape(1, H).astype(f32),
        "w1": params["w1"].T.astype(compute_dtype),
        "b1": params["b1"].reshape(1, I).astype(f32),
        "w2": params["w2"].T.astype(compute_dtype),
        "b2": params["b2"].reshape(1, H).astype(f32),
        "g2": params["ln2_g"].reshape(1, H).astype(f32),
        "be2": params["ln2_b"].reshape(1, H).astype(f32),
    }


def encoder_layer(x, prep, num_heads, *, tq=None, compute_dtype=jnp.float32,
                  vmem_limit_bytes=None):
    B, S, H = x.shape
    I = prep["w1"].shape[1]
    hd = H // num_heads

    if tq is None:
        # Big tiles amortize the ~0.35 µs per-grid-step overhead and fill MXU rows;
        # cap so the (nh, TQ, S) score block stays modest.
        tq = S
        for cand in (512, 256, 128):
            if S % cand == 0:
                tq = cand
                break
    assert S % tq == 0, "tq must divide S"
    n_q_tiles = S // tq

    if vmem_limit_bytes is None:
        # Explicit budget: double-buffered blocks + weights + K/V scratch + headroom for
        # Mosaic internal scratch and live intermediates. Clamped for small problems.
        itemsize = jnp.dtype(x.dtype).itemsize
        cbytes = jnp.dtype(compute_dtype).itemsize
        weight_bytes = sum(int(v.size) * v.dtype.itemsize for v in prep.values())
        block_bytes = (S * H + tq * H) * itemsize
        scratch_bytes = 2 * num_heads * S * hd * cbytes
        budget = 2 * (weight_bytes + block_bytes) + scratch_bytes + (16 << 20)
        vmem_limit_bytes = int(min(max(budget, 32 << 20), 96 << 20))

    def full(shape):
        return pl.BlockSpec(shape, lambda b, qi: (0,) * len(shape))

    kernel = functools.partial(
        encoder_layer_kernel, num_heads=num_heads, tq=tq, compute_dtype=compute_dtype)

    return pl.pallas_call(
        kernel,
        out_shape=jax.ShapeDtypeStruct((B, S, H), x.dtype),
        grid_spec=pltpu.PrefetchScalarGridSpec(
            num_scalar_prefetch=0,
            grid=(B, n_q_tiles),
            in_specs=[
                pl.BlockSpec((1, S, H), lambda b, qi: (b, 0, 0)),     # x (full seq, resident)
                full((H, H)),                                         # wq (pre-scaled)
                full((H, 2 * H)),                                     # wkv fused
                full((num_heads, hd, H)), full((1, H)),               # wd3, bd
                full((1, H)), full((1, H)),                           # ln1 gamma/beta
                full((H, I)), full((1, I)),                           # w1, b1
                full((I, H)), full((1, H)),                           # w2, b2
                full((1, H)), full((1, H)),                           # ln2 gamma/beta
            ],
            out_specs=pl.BlockSpec((1, tq, H), lambda b, qi: (b, qi, 0)),
            scratch_shapes=[
                pltpu.VMEM((num_heads, hd, S), compute_dtype),        # K^T cache (lane = S)
                pltpu.VMEM((num_heads, S, hd), compute_dtype),        # V cache
            ],
        ),
        compiler_params=pltpu.CompilerParams(
            # qi must stay "arbitrary": K/V scratch is filled only at qi == 0.
            dimension_semantics=("parallel", "arbitrary"),
            vmem_limit_bytes=vmem_limit_bytes,
        ),
    )(x,
      prep["wq"], prep["wkv"], prep["wd3"], prep["bd"],
      prep["g1"], prep["be1"], prep["w1"], prep["b1"],
      prep["w2"], prep["b2"], prep["g2"], prep["be2"])


def _ref_encoder_layer(x, params, num_heads):
    """Pure-JAX reference (mirrors the PyTorch forward, dropout = identity)."""
    B, S, H = x.shape
    hd = H // num_heads
    q = x @ params["wq"].T
    k = x @ params["wk"].T
    v = x @ params["wv"].T

    def split(t):  # (B,S,H) -> (B,nh,S,hd)
        return t.reshape(B, S, num_heads, hd).transpose(0, 2, 1, 3)

    qh, kh, vh = split(q), split(k), split(v)
    s = jnp.einsum("bhqd,bhkd->bhqk", qh, kh) / math.sqrt(hd)
    p = jax.nn.softmax(s, axis=-1)
    ctx = jnp.einsum("bhqk,bhkd->bhqd", p, vh).transpose(0, 2, 1, 3).reshape(B, S, H)
    a = ctx @ params["wd"].T + params["bd"] + x
    mu = a.mean(-1, keepdims=True); var = ((a - mu) ** 2).mean(-1, keepdims=True)
    a = (a - mu) / jnp.sqrt(var + 1e-6) * params["ln1_g"] + params["ln1_b"]
    f = jax.nn.relu(a @ params["w1"].T + params["b1"]) @ params["w2"].T + params["b2"] + a
    mu = f.mean(-1, keepdims=True); var = ((f - mu) ** 2).mean(-1, keepdims=True)
    return (f - mu) / jnp.sqrt(var + 1e-6) * params["ln2_g"] + params["ln2_b"]


if __name__ == "__main__":
    B, S, H, I, NH, TQ = 2, 16, 32, 64, 4, 8

    key = jax.random.PRNGKey(0)
    keys = jax.random.split(key, 10)

    def lin_init(k, out_dim, in_dim):
        bound = 1.0 / math.sqrt(in_dim)
        return jax.random.uniform(k, (out_dim, in_dim), jnp.float32, -bound, bound)

    params = {
        "wq": lin_init(keys[0], H, H),
        "wk": lin_init(keys[1], H, H),
        "wv": lin_init(keys[2], H, H),
        "wd": lin_init(keys[3], H, H),
        "bd": jax.random.uniform(keys[4], (H,), jnp.float32, -1 / math.sqrt(H), 1 / math.sqrt(H)),
        "ln1_g": jnp.ones((H,), jnp.float32),
        "ln1_b": jnp.zeros((H,), jnp.float32),
        "w1": lin_init(keys[5], I, H),
        "b1": jax.random.uniform(keys[6], (I,), jnp.float32, -1 / math.sqrt(H), 1 / math.sqrt(H)),
        "w2": lin_init(keys[7], H, I),
        "b2": jax.random.uniform(keys[8], (H,), jnp.float32, -1 / math.sqrt(I), 1 / math.sqrt(I)),
        "ln2_g": jnp.ones((H,), jnp.float32),
        "ln2_b": jnp.zeros((H,), jnp.float32),
    }

    x = jax.random.normal(keys[9], (B, S, H), jnp.float32)
    ref = _ref_encoder_layer(x, params, NH)

    # f32 matmul-operand path (closest to the PyTorch module's numerics).
    prep_f32 = prepare_encoder_params(params, NH, compute_dtype=jnp.float32)
    out_f32 = jax.block_until_ready(encoder_layer(x, prep_f32, NH, tq=TQ))
    assert out_f32.shape == (B, S, H)
    # tolerance accommodates the approx (EUP) softmax reciprocal
    assert jnp.allclose(out_f32, ref, atol=1e-2, rtol=1e-2), "f32 path mismatch vs JAX reference"

    # bf16 matmul-operand path (f32 accumulation) — MXU-friendly on v5e/v6e/v7x.
    prep_bf16 = prepare_encoder_params(params, NH, compute_dtype=jnp.bfloat16)
    out_bf16 = jax.block_until_ready(encoder_layer(x, prep_bf16, NH, tq=TQ))
    err_bf16 = float(jnp.max(jnp.abs(out_bf16 - ref)))
    assert err_bf16 < 1e-1, f"bf16 path mismatch vs JAX reference (max |diff| = {err_bf16})"

    print("KERNEL_OK")
</pallas_src>

<mosaic_0001>
module attributes {stable_mosaic.version = 11 : i64} {
  func.func @encoder_layer_kernel(%arg0: i32, %arg1: i32, %arg2: memref<1x16x32xf32, #tpu.memory_space<vmem>>, %arg3: memref<32x32xf32, #tpu.memory_space<vmem>>, %arg4: memref<32x64xf32, #tpu.memory_space<vmem>>, %arg5: memref<4x8x32xf32, #tpu.memory_space<vmem>>, %arg6: memref<1x32xf32, #tpu.memory_space<vmem>>, %arg7: memref<1x32xf32, #tpu.memory_space<vmem>>, %arg8: memref<1x32xf32, #tpu.memory_space<vmem>>, %arg9: memref<32x64xf32, #tpu.memory_space<vmem>>, %arg10: memref<1x64xf32, #tpu.memory_space<vmem>>, %arg11: memref<64x32xf32, #tpu.memory_space<vmem>>, %arg12: memref<1x32xf32, #tpu.memory_space<vmem>>, %arg13: memref<1x32xf32, #tpu.memory_space<vmem>>, %arg14: memref<1x32xf32, #tpu.memory_space<vmem>>, %arg15: memref<1x8x32xf32, #tpu.memory_space<vmem>>, %arg16: memref<4x8x16xf32, #tpu.memory_space<vmem>>, %arg17: memref<4x16x8xf32, #tpu.memory_space<vmem>>) attributes {dimension_semantics = [#tpu.dimension_semantics<parallel>, #tpu.dimension_semantics<arbitrary>], iteration_bounds = array<i64: 2, 2>, scalar_prefetch = 0 : i64, scratch_operands = 2 : i64, tpu.core_type = #tpu.core_type<tc>, window_params = [{transform_indices = @transform_0, window_bounds = array<i64: 1, 16, 32>}, {pipeline_mode = #tpu.pipeline_mode<synchronous>, transform_indices = @transform_1, window_bounds = array<i64: 32, 32>}, {pipeline_mode = #tpu.pipeline_mode<synchronous>, transform_indices = @transform_2, window_bounds = array<i64: 32, 64>}, {pipeline_mode = #tpu.pipeline_mode<synchronous>, transform_indices = @transform_3, window_bounds = array<i64: 4, 8, 32>}, {pipeline_mode = #tpu.pipeline_mode<synchronous>, transform_indices = @transform_4, window_bounds = array<i64: 1, 32>}, {pipeline_mode = #tpu.pipeline_mode<synchronous>, transform_indices = @transform_5, window_bounds = array<i64: 1, 32>}, {pipeline_mode = #tpu.pipeline_mode<synchronous>, transform_indices = @transform_6, window_bounds = array<i64: 1, 32>}, {pipeline_mode = #tpu.pipeline_mode<synchronous>, transform_indices = @transform_7, window_bounds = array<i64: 32, 64>}, {pipeline_mode = #tpu.pipeline_mode<synchronous>, transform_indices = @transform_8, window_bounds = array<i64: 1, 64>}, {pipeline_mode = #tpu.pipeline_mode<synchronous>, transform_indices = @transform_9, window_bounds = array<i64: 64, 32>}, {pipeline_mode = #tpu.pipeline_mode<synchronous>, transform_indices = @transform_10, window_bounds = array<i64: 1, 32>}, {pipeline_mode = #tpu.pipeline_mode<synchronous>, transform_indices = @transform_11, window_bounds = array<i64: 1, 32>}, {pipeline_mode = #tpu.pipeline_mode<synchronous>, transform_indices = @transform_12, window_bounds = array<i64: 1, 32>}, {transform_indices = @transform_13, window_bounds = array<i64: 1, 8, 32>}]} {
    %c0_i32 = arith.constant 0 : i32
    %0 = arith.cmpi eq, %arg1, %c0_i32 : i32
    %1 = arith.extui %0 : i1 to i32
    %c0_i32_0 = arith.constant 0 : i32
    %2 = arith.cmpi ne, %1, %c0_i32_0 : i32
    scf.if %2 {
      %c0_53 = arith.constant 0 : index
      %c0_54 = arith.constant 0 : index
      %c0_55 = arith.constant 0 : index
      %97 = vector.load %arg2[%c0_53, %c0_54, %c0_55] : memref<1x16x32xf32, #tpu.memory_space<vmem>>, vector<1x16x32xf32>
      %98 = vector.shape_cast %97 : vector<1x16x32xf32> to vector<16x32xf32>
      %c0_56 = arith.constant 0 : index
      %c0_57 = arith.constant 0 : index
      %99 = vector.load %arg4[%c0_56, %c0_57] : memref<32x64xf32, #tpu.memory_space<vmem>>, vector<32x64xf32>
      %cst_58 = arith.constant dense<0.000000e+00> : vector<16x64xf32>
      %100 = tpu.matmul %98, %99, %cst_58 {dimension_numbers = #tpu.dot_dimension_numbers<[1], [0], [0], [1], [0, 0, 1, 1], [], []>} : vector<16x32xf32>, vector<32x64xf32>, vector<16x64xf32> -> vector<16x64xf32>
      %101 = vector.extract_strided_slice %100 {offsets = [0, 0], sizes = [16, 32], strides = [1, 1]} : vector<16x64xf32> to vector<16x32xf32>
      %102 = tpu.transpose %101, [1, 0] : vector<16x32xf32> -> vector<32x16xf32>
      %103 = vector.shape_cast %102 : vector<32x16xf32> to vector<4x8x16xf32>
      %c0_59 = arith.constant 0 : index
      %c0_60 = arith.constant 0 : index
      %c0_61 = arith.constant 0 : index
      %104 = vector.load %arg16[%c0_59, %c0_60, %c0_61] : memref<4x8x16xf32, #tpu.memory_space<vmem>>, vector<4x8x16xf32>
      tpu.vector_store %arg16[%c0_59, %c0_60, %c0_61], %103 {strides = array<i32>} : memref<4x8x16xf32, #tpu.memory_space<vmem>>, vector<4x8x16xf32>,
      %105 = vector.extract_strided_slice %100 {offsets = [0, 32], sizes = [16, 32], strides = [1, 1]} : vector<16x64xf32> to vector<16x32xf32>
      %106 = vector.shape_cast %105 : vector<16x32xf32> to vector<16x4x8xf32>
      %107 = tpu.transpose %106, [1, 0, 2] : vector<16x4x8xf32> -> vector<4x16x8xf32>
      %c0_62 = arith.constant 0 : index
      %c0_63 = arith.constant 0 : index
      %c0_64 = arith.constant 0 : index
      %108 = vector.load %arg17[%c0_62, %c0_63, %c0_64] : memref<4x16x8xf32, #tpu.memory_space<vmem>>, vector<4x16x8xf32>
      tpu.vector_store %arg17[%c0_62, %c0_63, %c0_64], %107 {strides = array<i32>} : memref<4x16x8xf32, #tpu.memory_space<vmem>>, vector<4x16x8xf32>,
    } else {
    }
    %c8_i32 = arith.constant 8 : i32
    %3 = arith.muli %arg1, %c8_i32 : i32
    %4 = tpu.assume_multiple %3, 8 : i32
    %c0 = arith.constant 0 : index
    %5 = arith.index_cast %4 : i32 to index
    %c0_1 = arith.constant 0 : index
    %6 = vector.load %arg2[%c0, %5, %c0_1] : memref<1x16x32xf32, #tpu.memory_space<vmem>>, vector<1x8x32xf32>
    %7 = vector.shape_cast %6 : vector<1x8x32xf32> to vector<8x32xf32>
    %c0_2 = arith.constant 0 : index
    %c0_3 = arith.constant 0 : index
    %8 = vector.load %arg3[%c0_2, %c0_3] : memref<32x32xf32, #tpu.memory_space<vmem>>, vector<32x32xf32>
    %cst = arith.constant dense<0.000000e+00> : vector<8x32xf32>
    %9 = tpu.matmul %7, %8, %cst {dimension_numbers = #tpu.dot_dimension_numbers<[1], [0], [0], [1], [0, 0, 1, 1], [], []>} : vector<8x32xf32>, vector<32x32xf32>, vector<8x32xf32> -> vector<8x32xf32>
    %10 = vector.shape_cast %9 : vector<8x32xf32> to vector<8x4x8xf32>
    %11 = tpu.transpose %10, [1, 0, 2] : vector<8x4x8xf32> -> vector<4x8x8xf32>
    %c0_4 = arith.constant 0 : index
    %c0_5 = arith.constant 0 : index
    %c0_6 = arith.constant 0 : index
    %12 = vector.load %arg16[%c0_4, %c0_5, %c0_6] : memref<4x8x16xf32, #tpu.memory_space<vmem>>, vector<4x8x16xf32>
    "tpu.trace_start"() <{level = 10 : i32, message = "hqd,hdk->hqk"}> : () -> ()
    %cst_7 = arith.constant dense<0.000000e+00> : vector<4x8x16xf32>
    %13 = tpu.matmul %11, %12, %cst_7 {dimension_numbers = #tpu.dot_dimension_numbers<[2], [1], [1], [2], [0, 0, 0, 1, 1, 2], [0], [0]>} : vector<4x8x8xf32>, vector<4x8x16xf32>, vector<4x8x16xf32> -> vector<4x8x16xf32>
    "tpu.trace_stop"() : () -> ()
    %cst_8 = arith.constant dense<0xFF800000> : vector<4x8xf32>
    %14 = vector.multi_reduction <maximumf>, %13, %cst_8 [2] : vector<4x8x16xf32> to vector<4x8xf32>
    %15 = vector.shape_cast %14 : vector<4x8xf32> to vector<4x8x1xf32>
    %16 = vector.broadcast %15 : vector<4x8x1xf32> to vector<4x8x16xf32>
    %17 = arith.subf %13, %16 : vector<4x8x16xf32>
    %18 = math.exp %17 : vector<4x8x16xf32>
    %cst_9 = arith.constant dense<0.000000e+00> : vector<4x8xf32>
    %19 = vector.multi_reduction <add>, %18, %cst_9 [2] : vector<4x8x16xf32> to vector<4x8xf32>
    %20 = vector.shape_cast %19 : vector<4x8xf32> to vector<4x8x1xf32>
    %c0_10 = arith.constant 0 : index
    %c0_11 = arith.constant 0 : index
    %c0_12 = arith.constant 0 : index
    %21 = vector.load %arg17[%c0_10, %c0_11, %c0_12] : memref<4x16x8xf32, #tpu.memory_space<vmem>>, vector<4x16x8xf32>
    "tpu.trace_start"() <{level = 10 : i32, message = "hqk,hkd->hqd"}> : () -> ()
    %cst_13 = arith.constant dense<0.000000e+00> : vector<4x8x8xf32>
    %22 = tpu.matmul %18, %21, %cst_13 {dimension_numbers = #tpu.dot_dimension_numbers<[2], [1], [1], [2], [0, 0, 0, 1, 1, 2], [0], [0]>} : vector<4x8x16xf32>, vector<4x16x8xf32>, vector<4x8x8xf32> -> vector<4x8x8xf32>
    "tpu.trace_stop"() : () -> ()
    %23 = tpu.reciprocal %20 {approx = true} : vector<4x8x1xf32> -> vector<4x8x1xf32>
    %24 = vector.broadcast %23 : vector<4x8x1xf32> to vector<4x8x8xf32>
    %25 = arith.mulf %22, %24 : vector<4x8x8xf32>
    %c0_14 = arith.constant 0 : index
    %c0_15 = arith.constant 0 : index
    %c0_16 = arith.constant 0 : index
    %26 = vector.load %arg5[%c0_14, %c0_15, %c0_16] : memref<4x8x32xf32, #tpu.memory_space<vmem>>, vector<4x8x32xf32>
    "tpu.trace_start"() <{level = 10 : i32, message = "hqd,hdo->hqo"}> : () -> ()
    %cst_17 = arith.constant dense<0.000000e+00> : vector<4x8x32xf32>
    %27 = tpu.matmul %25, %26, %cst_17 {dimension_numbers = #tpu.dot_dimension_numbers<[2], [1], [1], [2], [0, 0, 0, 1, 1, 2], [0], [0]>} : vector<4x8x8xf32>, vector<4x8x32xf32>, vector<4x8x32xf32> -> vector<4x8x32xf32>
    "tpu.trace_stop"() : () -> ()
    %cst_18 = arith.constant dense<0.000000e+00> : vector<8x32xf32>
    %28 = vector.multi_reduction <add>, %27, %cst_18 [0] : vector<4x8x32xf32> to vector<8x32xf32>
    %c0_19 = arith.constant 0 : index
    %c0_20 = arith.constant 0 : index
    %29 = vector.load %arg6[%c0_19, %c0_20] : memref<1x32xf32, #tpu.memory_space<vmem>>, vector<1x32xf32>
    %30 = vector.broadcast %29 : vector<1x32xf32> to vector<8x32xf32>
    %31 = arith.addf %28, %30 : vector<8x32xf32>
    %32 = arith.addf %31, %7 : vector<8x32xf32>
    %c0_21 = arith.constant 0 : index
    %c0_22 = arith.constant 0 : index
    %33 = vector.load %arg7[%c0_21, %c0_22] : memref<1x32xf32, #tpu.memory_space<vmem>>, vector<1x32xf32>
    %c0_23 = arith.constant 0 : index
    %c0_24 = arith.constant 0 : index
    %34 = vector.load %arg8[%c0_23, %c0_24] : memref<1x32xf32, #tpu.memory_space<vmem>>, vector<1x32xf32>
    %cst_25 = arith.constant dense<0.000000e+00> : vector<8xf32>
    %35 = vector.multi_reduction <add>, %32, %cst_25 [1] : vector<8x32xf32> to vector<8xf32>
    %36 = vector.shape_cast %35 : vector<8xf32> to vector<8x1xf32>
    %cst_26 = arith.constant 3.200000e+01 : f32
    %37 = vector.broadcast %cst_26 : f32 to vector<8x1xf32>
    %38 = arith.divf %36, %37 : vector<8x1xf32>
    %39 = vector.broadcast %38 : vector<8x1xf32> to vector<8x32xf32>
    %40 = arith.subf %32, %39 : vector<8x32xf32>
    %41 = arith.mulf %40, %40 : vector<8x32xf32>
    %cst_27 = arith.constant dense<0.000000e+00> : vector<8xf32>
    %42 = vector.multi_reduction <add>, %41, %cst_27 [1] : vector<8x32xf32> to vector<8xf32>
    %43 = vector.shape_cast %42 : vector<8xf32> to vector<8x1xf32>
    %cst_28 = arith.constant 3.200000e+01 : f32
    %44 = vector.broadcast %cst_28 : f32 to vector<8x1xf32>
    %45 = arith.divf %43, %44 : vector<8x1xf32>
    %46 = vector.broadcast %38 : vector<8x1xf32> to vector<8x32xf32>
    %47 = arith.subf %32, %46 : vector<8x32xf32>
    %cst_29 = arith.constant 9.99999997E-7 : f32
    %48 = vector.broadcast %cst_29 : f32 to vector<8x1xf32>
    %49 = arith.addf %45, %48 : vector<8x1xf32>
    %50 = math.rsqrt %49 : vector<8x1xf32>
    %51 = vector.broadcast %50 : vector<8x1xf32> to vector<8x32xf32>
    %52 = arith.mulf %47, %51 : vector<8x32xf32>
    %53 = vector.broadcast %33 : vector<1x32xf32> to vector<8x32xf32>
    %54 = arith.mulf %52, %53 : vector<8x32xf32>
    %55 = vector.broadcast %34 : vector<1x32xf32> to vector<8x32xf32>
    %56 = arith.addf %54, %55 : vector<8x32xf32>
    %c0_30 = arith.constant 0 : index
    %c0_31 = arith.constant 0 : index
    %57 = vector.load %arg9[%c0_30, %c0_31] : memref<32x64xf32, #tpu.memory_space<vmem>>, vector<32x64xf32>
    %cst_32 = arith.constant dense<0.000000e+00> : vector<8x64xf32>
    %58 = tpu.matmul %56, %57, %cst_32 {dimension_numbers = #tpu.dot_dimension_numbers<[1], [0], [0], [1], [0, 0, 1, 1], [], []>} : vector<8x32xf32>, vector<32x64xf32>, vector<8x64xf32> -> vector<8x64xf32>
    %c0_33 = arith.constant 0 : index
    %c0_34 = arith.constant 0 : index
    %59 = vector.load %arg10[%c0_33, %c0_34] : memref<1x64xf32, #tpu.memory_space<vmem>>, vector<1x64xf32>
    %60 = vector.broadcast %59 : vector<1x64xf32> to vector<8x64xf32>
    %61 = arith.addf %58, %60 : vector<8x64xf32>
    %cst_35 = arith.constant 0.000000e+00 : f32
    %62 = vector.broadcast %cst_35 : f32 to vector<8x64xf32>
    %63 = arith.maximumf %61, %62 : vector<8x64xf32>
    %c0_36 = arith.constant 0 : index
    %c0_37 = arith.constant 0 : index
    %64 = vector.load %arg11[%c0_36, %c0_37] : memref<64x32xf32, #tpu.memory_space<vmem>>, vector<64x32xf32>
    %cst_38 = arith.constant dense<0.000000e+00> : vector<8x32xf32>
    %65 = tpu.matmul %63, %64, %cst_38 {dimension_numbers = #tpu.dot_dimension_numbers<[1], [0], [0], [1], [0, 0, 1, 1], [], []>} : vector<8x64xf32>, vector<64x32xf32>, vector<8x32xf32> -> vector<8x32xf32>
    %c0_39 = arith.constant 0 : index
    %c0_40 = arith.constant 0 : index
    %66 = vector.load %arg12[%c0_39, %c0_40] : memref<1x32xf32, #tpu.memory_space<vmem>>, vector<1x32xf32>
    %67 = vector.broadcast %66 : vector<1x32xf32> to vector<8x32xf32>
    %68 = arith.addf %65, %67 : vector<8x32xf32>
    %69 = arith.addf %68, %56 : vector<8x32xf32>
    %c0_41 = arith.constant 0 : index
    %c0_42 = arith.constant 0 : index
    %70 = vector.load %arg13[%c0_41, %c0_42] : memref<1x32xf32, #tpu.memory_space<vmem>>, vector<1x32xf32>
    %c0_43 = arith.constant 0 : index
    %c0_44 = arith.constant 0 : index
    %71 = vector.load %arg14[%c0_43, %c0_44] : memref<1x32xf32, #tpu.memory_space<vmem>>, vector<1x32xf32>
    %cst_45 = arith.constant dense<0.000000e+00> : vector<8xf32>
    %72 = vector.multi_reduction <add>, %69, %cst_45 [1] : vector<8x32xf32> to vector<8xf32>
    %73 = vector.shape_cast %72 : vector<8xf32> to vector<8x1xf32>
    %cst_46 = arith.constant 3.200000e+01 : f32
    %74 = vector.broadcast %cst_46 : f32 to vector<8x1xf32>
    %75 = arith.divf %73, %74 : vector<8x1xf32>
    %76 = vector.broadcast %75 : vector<8x1xf32> to vector<8x32xf32>
    %77 = arith.subf %69, %76 : vector<8x32xf32>
    %78 = arith.mulf %77, %77 : vector<8x32xf32>
    %cst_47 = arith.constant dense<0.000000e+00> : vector<8xf32>
    %79 = vector.multi_reduction <add>, %78, %cst_47 [1] : vector<8x32xf32> to vector<8xf32>
    %80 = vector.shape_cast %79 : vector<8xf32> to vector<8x1xf32>
    %cst_48 = arith.constant 3.200000e+01 : f32
    %81 = vector.broadcast %cst_48 : f32 to vector<8x1xf32>
    %82 = arith.divf %80, %81 : vector<8x1xf32>
    %83 = vector.broadcast %75 : vector<8x1xf32> to vector<8x32xf32>
    %84 = arith.subf %69, %83 : vector<8x32xf32>
    %cst_49 = arith.constant 9.99999997E-7 : f32
    %85 = vector.broadcast %cst_49 : f32 to vector<8x1xf32>
    %86 = arith.addf %82, %85 : vector<8x1xf32>
    %87 = math.rsqrt %86 : vector<8x1xf32>
    %88 = vector.broadcast %87 : vector<8x1xf32> to vector<8x32xf32>
    %89 = arith.mulf %84, %88 : vector<8x32xf32>
    %90 = vector.broadcast %70 : vector<1x32xf32> to vector<8x32xf32>
    %91 = arith.mulf %89, %90 : vector<8x32xf32>
    %92 = vector.broadcast %71 : vector<1x32xf32> to vector<8x32xf32>
    %93 = arith.addf %91, %92 : vector<8x32xf32>
    %c0_50 = arith.constant 0 : index
    %c0_51 = arith.constant 0 : index
    %c0_52 = arith.constant 0 : index
    %94 = vector.load %arg15[%c0_50, %c0_51, %c0_52] : memref<1x8x32xf32, #tpu.memory_space<vmem>>, vector<1x8x32xf32>
    %95 = vector.shape_cast %94 : vector<1x8x32xf32> to vector<8x32xf32>
    %96 = vector.shape_cast %93 : vector<8x32xf32> to vector<1x8x32xf32>
    tpu.vector_store %arg15[%c0_50, %c0_51, %c0_52], %96 {strides = array<i32>} : memref<1x8x32xf32, #tpu.memory_space<vmem>>, vector<1x8x32xf32>,
    return
  }
  func.func @transform_0(%arg0: i32, %arg1: i32) -> (i32, i32, i32) {
    %c0_i32 = arith.constant 0 : i32
    %c0_i32_0 = arith.constant 0 : i32
    %c0_i32_1 = arith.constant 0 : i32
    return %arg0, %c0_i32, %c0_i32_0 : i32, i32, i32
  }
  func.func @transform_1(%arg0: i32, %arg1: i32) -> (i32, i32) {
    %c0_i32 = arith.constant 0 : i32
    %c0_i32_0 = arith.constant 0 : i32
    %c0_i32_1 = arith.constant 0 : i32
    return %c0_i32, %c0_i32_0 : i32, i32
  }
  func.func @transform_2(%arg0: i32, %arg1: i32) -> (i32, i32) {
    %c0_i32 = arith.constant 0 : i32
    %c0_i32_0 = arith.constant 0 : i32
    %c0_i32_1 = arith.constant 0 : i32
    return %c0_i32, %c0_i32_0 : i32, i32
  }
  func.func @transform_3(%arg0: i32, %arg1: i32) -> (i32, i32, i32) {
    %c0_i32 = arith.constant 0 : i32
    %c0_i32_0 = arith.constant 0 : i32
    %c0_i32_1 = arith.constant 0 : i32
    %c0_i32_2 = arith.constant 0 : i32
    return %c0_i32, %c0_i32_0, %c0_i32_1 : i32, i32, i32
  }
  func.func @transform_4(%arg0: i32, %arg1: i32) -> (i32, i32) {
    %c0_i32 = arith.constant 0 : i32
    %c0_i32_0 = arith.constant 0 : i32
    %c0_i32_1 = arith.constant 0 : i32
    return %c0_i32, %c0_i32_0 : i32, i32
  }
  func.func @transform_5(%arg0: i32, %arg1: i32) -> (i32, i32) {
    %c0_i32 = arith.constant 0 : i32
    %c0_i32_0 = arith.constant 0 : i32
    %c0_i32_1 = arith.constant 0 : i32
    return %c0_i32, %c0_i32_0 : i32, i32
  }
  func.func @transform_6(%arg0: i32, %arg1: i32) -> (i32, i32) {
    %c0_i32 = arith.constant 0 : i32
    %c0_i32_0 = arith.constant 0 : i32
    %c0_i32_1 = arith.constant 0 : i32
    return %c0_i32, %c0_i32_0 : i32, i32
  }
  func.func @transform_7(%arg0: i32, %arg1: i32) -> (i32, i32) {
    %c0_i32 = arith.constant 0 : i32
    %c0_i32_0 = arith.constant 0 : i32
    %c0_i32_1 = arith.constant 0 : i32
    return %c0_i32, %c0_i32_0 : i32, i32
  }
  func.func @transform_8(%arg0: i32, %arg1: i32) -> (i32, i32) {
    %c0_i32 = arith.constant 0 : i32
    %c0_i32_0 = arith.constant 0 : i32
    %c0_i32_1 = arith.constant 0 : i32
    return %c0_i32, %c0_i32_0 : i32, i32
  }
  func.func @transform_9(%arg0: i32, %arg1: i32) -> (i32, i32) {
    %c0_i32 = arith.constant 0 : i32
    %c0_i32_0 = arith.constant 0 : i32
    %c0_i32_1 = arith.constant 0 : i32
    return %c0_i32, %c0_i32_0 : i32, i32
  }
  func.func @transform_10(%arg0: i32, %arg1: i32) -> (i32, i32) {
    %c0_i32 = arith.constant 0 : i32
    %c0_i32_0 = arith.constant 0 : i32
    %c0_i32_1 = arith.constant 0 : i32
    return %c0_i32, %c0_i32_0 : i32, i32
  }
  func.func @transform_11(%arg0: i32, %arg1: i32) -> (i32, i32) {
    %c0_i32 = arith.constant 0 : i32
    %c0_i32_0 = arith.constant 0 : i32
    %c0_i32_1 = arith.constant 0 : i32
    return %c0_i32, %c0_i32_0 : i32, i32
  }
  func.func @transform_12(%arg0: i32, %arg1: i32) -> (i32, i32) {
    %c0_i32 = arith.constant 0 : i32
    %c0_i32_0 = arith.constant 0 : i32
    %c0_i32_1 = arith.constant 0 : i32
    return %c0_i32, %c0_i32_0 : i32, i32
  }
  func.func @transform_13(%arg0: i32, %arg1: i32) -> (i32, i32, i32) {
    %c0_i32 = arith.constant 0 : i32
    %c0_i32_0 = arith.constant 0 : i32
    return %arg0, %arg1, %c0_i32 : i32, i32, i32
  }
}

</mosaic_0001>

<bundles_post_ra>
// kernel: tpu_custom_call.1
= control target key start
LH: loop header
LB: loop body
LE: loop exit
PB: predicated region body
PF: predicated region fallthrough
CT: control target
= control target key end

     0   :  { %s3669_s0 = inlined_call_operand.vmem [shape: f32[2,16,32], index: 0, kind: input, shape index: {}]   ;;  %s3670_s1 = inlined_call_operand.vmem [shape: f32[32,32], index: 1, kind: input, shape index: {}]   ;;  %s3671_s2 = inlined_call_operand.vmem [shape: f32[32,64], index: 2, kind: input, shape index: {}]   ;;  %s3672_s3 = inlined_call_operand.hbm [shape: f32[4,8,32], index: 3, kind: input, shape index: {}]   ;;  %s3673_s4 = inlined_call_operand.vmem [shape: f32[1,32], index: 4, kind: input, shape index: {}]   ;;  %s3674_s5 = inlined_call_operand.vmem [shape: f32[1,32], index: 5, kind: input, shape index: {}]   ;;  %s3675_s6 = inlined_call_operand.hbm [shape: f32[1,32], index: 6, kind: input, shape index: {}]   ;;  %s3676_s7 = inlined_call_operand.hbm [shape: f32[32,64], index: 7, kind: input, shape index: {}]   ;;  %s3677_s8 = inlined_call_operand.hbm [shape: f32[1,64], index: 8, kind: input, shape index: {}]   ;;  %s3678_s9 = inlined_call_operand.vmem [shape: f32[64,32], index: 9, kind: input, shape index: {}]   ;;  %s3679_s10 = inlined_call_operand.vmem [shape: f32[1,32], index: 10, kind: input, shape index: {}]   ;;  %s3680_s11 = inlined_call_operand.vmem [shape: f32[1,32], index: 11, kind: input, shape index: {}]   ;;  %s3681_s12 = inlined_call_operand.vmem [shape: f32[1,32], index: 12, kind: input, shape index: {}]   ;;  %s3682_s13 = inlined_call_operand.hbm [shape: f32[2,16,32], index: 13, kind: output, shape index: {}]  }
   0x1   :  { %3699 = sst [smem:[#allocation27_spill]] %s3674_s5 }
   0x2   :  { %3700 = sst [smem:[#allocation28_spill]] %s3675_s6 }
   0x3   :  { %3701 = sst [smem:[#allocation29_spill]] %s3679_s10 }
   0x4   :  { %3702 = sst [smem:[#allocation30_spill]] %s3680_s11 }
   0x5   :  { %3703 = sst [smem:[#allocation31_spill]] %s3681_s12 }
   0x6   :  { %3704 = sst [smem:[#allocation32_spill]] %s3682_s13 }
   0x7   :  { %18 = vsyncpa [#allocation5], 0 }
   0x8   :  { %19 = vsyncpa [#allocation8], 0 }
   0x9   :  { %20 = vsyncpa [#allocation11], 0 }
   0xa   :  { %21 = vsyncpa [#allocation6], 0 }
   0xb   :  { %23 = vsyncpa [#allocation6 + $0x1], 0  ;;  %s3234_s25 = smov 0   ;;  %s3236_s26 = smov 0  }
   0xc   :  { %s3238_s27 = smov 0   ;;  %s3240_s28 = smov 0  }
   0xd   :  { %s3242_s29 = smov 0   ;;  %s3244_s30 = smov 0  }
   0xe   :  { %s3246_s14 = smov 0   ;;  %s3248_s15 = smov 0  }
   0xf LB: > { %3705 = sst [smem:[#allocation17_spill]] %s3113_s25  ;;  %s2503_s16 = sadd.s32 4294967295, %s3141_s15   ;;  %s3141_s15 = sphi %s3248_s15, %s29_s15   ;;  %s3137_s14 = sphi %s3246_s14, %s3741_s14   ;;  %s3133_s30 = sphi %s3244_s30, %s3740_s30   ;;  %s3129_s29 = sphi %s3242_s29, %s3739_s29   ;;  %s3125_s28 = sphi %s3240_s28, %s3738_s28   ;;  %s3121_s27 = sphi %s3238_s27, %s3737_s27   ;;  %s3117_s26 = sphi %s3236_s26, %s3743_s26   ;;  %s3113_s25 = sphi %s3234_s25, %s3742_s25  }
  0x10   : > { %3706 = sst [smem:[#allocation18_spill]] %s3121_s27  ;;  %s2504_s17 = sadd.s32 4294967294, %s3141_s15  }
  0x11   : > { %3707 = sst [smem:[#allocation19_spill]] %s3133_s30  ;;  %s38_s18 = sadd.s32 1, %s3133_s30 }
  0x12   : > { %3708 = sst [smem:[#allocation20_spill]] %s3137_s14  ;;  %s41_s19 = sadd.s32 1, %s3137_s14 }
  0x13   : > { %3709 = sst [smem:[#allocation21_spill]] %s3141_s15  ;;  %p39_p0 = scmp.ge.s32.totalorder %s38_s18, 2 }
  0x14   : > { %s328_s20 = sadd.s32 1, %s3121_s27  ;;  %p338_p1 = scmp.ne.s32.totalorder %s3121_s27, %s3117_s26 }
  0x15   : > { %p339_p2 = scmp.eq.s32.totalorder %s2503_s16, 3  ;;  %s3745_s18 = smov (%p39_p0, %s38_s18), 0 }
  0x16   : > { %3710 = sst [smem:[#allocation22_spill]] %s3745_s18  ;;  %s3747_s19 = smov (!%p39_p0, %s41_s19), %s3137_s14 }
  0x17   : > { %s324_s21 = ssub.s32 %s3133_s30, %s3745_s18  ;;  %p3286_p3 = por %p339_p2, %p338_p1 }
  0x18   : > { %p43_p4 = scmp.ge.s32.totalorder %s3747_s19, 2  ;;  %p344_p5 = scmp.ne.s32.totalorder %s3117_s26, %s3113_s25 }
  0x19   : > { %s3711_s22 = scalar_select %p3286_p3, 1, 0 }
  0x1a   : > { %p345_p6 = scmp.eq.s32.totalorder %s2504_s17, 3  ;;  %p2505_p7 = scmp.ge.s32.totalorder %s3141_s15, 1 }
  0x1b   : > { %3712 = sst [smem:[#allocation23_spill]] %s3711_s22  ;;  %s3749_s19 = smov (%p43_p4, %s3747_s19), 0 }
  0x1c   : > { %3713 = sst [smem:[#allocation24_spill]] %s3749_s19  ;;  %p3295_p8 = por %p345_p6, %p344_p5 }
  0x1d   : > { %p352_p9 = scmp.lt.s32.totalorder %s3141_s15, 5  ;;  %s323_s24 = ssub.s32 %s3137_s14, %s3749_s19 }
  0x1e   : > { %s3714_s23 = scalar_select %p3295_p8, 1, 0 }
  0x1f   : > { %s325_s13 = sor.u32 %s324_s21, %s323_s24  ;;  %p3302_p10 = pnand %p2505_p7, %p352_p9 }
  0x20   : > { %3715 = sst [smem:[#allocation25_spill]] %s3714_s23  ;;  %p326_p11 = scmp.eq.s32.totalorder %s325_s13, 0 }
  0x21   : > { %s3716_s18 = scalar_select %p3302_p10, 1, 0 }
  0x22   : > { %p3306_p12 = scmp.eq.s32.totalorder %s2503_s16, 0  ;;  %p2792_p13 = pneg %p3302_p10 }
  0x23   : > { %s3313_s17 = scalar_select %p326_p11, %s3121_s27, %s328_s20  }
  0x24   : > { %s3717_s30 = scalar_select %p3306_p12, 1, 0 }
  0x25   : > { %3718 = sst [smem:[#allocation26_spill]] %s3313_s17  ;;  %p3317_p0 = pnand %p3306_p12, %p2792_p13 }
  0x26   : > { %s3143_s21 = smov [#allocation7]   ;;  %s3720_s6 = sld [smem:[#allocation28_spill]] }
  0x27   : > { %s390_s24 = sshll.u32 %s3143_s21, 4  ;;  %p3329_p2 = pneg %p3317_p0  ;;  %s391_s24 = int_to_ptr.vmem [resolvable:$true] %s390_s24 }
  0x2c   : > { %s2923_s16 = scalar_lea.hbm %s3720_s6, 16 }
  0x2d   : > { %p2924_p1 = scmp.ne.s32.totalorder %s3720_s6, %s2923_s16  ;;  %p2930_p6 = scmp.lt.u32.totalorder %s2923_s16, %s3720_s6 }
  0x2f   : > { %p2926_p4 = pnand %p3329_p2, %p2924_p1 }
  0x31   : > { %p2927_p5 = pneg %p2926_p4 }
  0x33   : > { %p2932_p7 = pnand %p2930_p6, %p2927_p5 }
  0x35   : > { %2935 = shalt.err (!%p2932_p7)
}
  0x36   : > { %s2936_s19 = scalar_lea.vmem %s391_s24, 16  ;;  %s2943_s25 = scalar_lea.vmem %s391_s24, 32 }
  0x37   : > { %p2937_p9 = scmp.ne.s32.totalorder %s391_s24, %s2936_s19  ;;  %p2944_p8 = scmp.lt.s32.totalorder %s391_s24, %s391_s24 }
  0x38   : > { %p2945_p3 = scmp.lt.s32.totalorder %s2943_s25, %s2936_s19 }
  0x39   : > { %p2939_p11 = pnand %p2937_p9, %p3329_p2 }
  0x3a   : > { %p2946_p12 = por %p2945_p3, %p2944_p8 }
  0x3b   : > { %p2940_p13 = pneg %p2939_p11 }
  0x3d   : > { %p2947_p10 = pnand %p2946_p12, %p2940_p13 }
  0x3f   : > { %2950 = shalt.err (!%p2947_p10)
}
  0x40   : > { %2798 = dma.hbm_to_vmem [thread:$0]  (!%p3317_p0), %s3720_s6, 16, %s391_s24, [#allocation8]  }
  0x41   : > { %s3144_s17 = smov [#allocation4]   ;;  %s2951_s15 = scalar_lea.hbm %s3672_s3, 512 }
  0x42   : > { %s370_s16 = sshll.u32 %s3144_s17, 4  ;;  %p2952_p3 = scmp.ne.s32.totalorder %s3672_s3, %s2951_s15  ;;  %s371_s16 = int_to_ptr.vmem [resolvable:$true] %s370_s16 }
  0x43   : > { %p2958_p12 = scmp.lt.u32.totalorder %s2951_s15, %s3672_s3 }
  0x44   : > { %p2954_p8 = pnand %p2952_p3, %p3329_p2 }
  0x46   : > { %p2955_p10 = pneg %p2954_p8 }
  0x48   : > { %p2960_p1 = pnand %p2958_p12, %p2955_p10 }
  0x4a   : > { %2963 = shalt.err (!%p2960_p1)
}
  0x4b   : > { %s2964_s24 = scalar_lea.vmem %s371_s16, 512  ;;  %p2972_p7 = scmp.lt.s32.totalorder %s371_s16, %s371_s16 }
  0x4c   : > { %p2965_p4 = scmp.ne.s32.totalorder %s371_s16, %s2964_s24  ;;  %p2973_p9 = scmp.lt.s32.totalorder %s2964_s24, %s2964_s24 }
  0x4e   : > { %p2967_p5 = pnand %p2965_p4, %p3329_p2  ;;  %p2974_p11 = por %p2973_p9, %p2972_p7 }
  0x50   : > { %p2968_p6 = pneg %p2967_p5 }
  0x52   : > { %p2975_p13 = pnand %p2974_p11, %p2968_p6 }
  0x54   : > { %2978 = shalt.err (!%p2975_p13)
}
  0x55   : > { %s3145_s11 = smov 128   ;;  %s3146_s12 = smov 8  }
  0x56   : > { %2795 = dma.hbm_to_vmem [thread:$0]  (!%p3317_p0), %s3672_s3, 512, %s371_s16, [#allocation5], %s3145_s11, %s3145_s11, %s3146_s12  }
  0x57   : > { %s3147_s14 = smov [#allocation9]   ;;  %s3148_s17 = smov [#allocation10]  }
  0x58   : > { %s400_s13 = sshll.u32 %s3147_s14, 4  ;;  %s414_s21 = sshll.u32 %s3148_s17, 4  ;;  %s401_s13 = int_to_ptr.vmem [resolvable:$true] %s400_s13  ;;  %s415_s21 = int_to_ptr.vmem [resolvable:$true] %s414_s21 }
  0x59   : > { %s2979_s24 = scalar_lea.hbm %s3676_s7, 512 }
  0x5a   : > { %p2980_p3 = scmp.ne.s32.totalorder %s3676_s7, %s2979_s24  ;;  %p2986_p12 = scmp.lt.u32.totalorder %s2979_s24, %s3676_s7 }
  0x5c   : > { %p2982_p8 = pnand %p2980_p3, %p3329_p2 }
  0x5e   : > { %p2983_p10 = pneg %p2982_p8 }
  0x60   : > { %p2988_p1 = pnand %p2986_p12, %p2983_p10 }
  0x62   : > { %2991 = shalt.err (!%p2988_p1)
}
  0x63   : > { %s2992_s16 = scalar_lea.vmem %s401_s13, 512  ;;  %p3000_p7 = scmp.lt.s32.totalorder %s401_s13, %s401_s13 }
  0x64   : > { %p2993_p4 = scmp.ne.s32.totalorder %s401_s13, %s2992_s16  ;;  %p3001_p9 = scmp.lt.s32.totalorder %s2992_s16, %s2992_s16 }
  0x66   : > { %p2995_p5 = pnand %p2993_p4, %p3329_p2  ;;  %p3002_p11 = por %p3001_p9, %p3000_p7 }
  0x68   : > { %p2996_p6 = pneg %p2995_p5 }
  0x6a   : > { %p3003_p13 = pnand %p3002_p11, %p2996_p6 }
  0x6c   : > { %3006 = shalt.err (!%p3003_p13)
}
  0x6d   : > { %2801 = dma.hbm_to_vmem [thread:$0]  (!%p3317_p0), %s3676_s7, 512, %s401_s13, [#allocation8], %s3145_s11, %s3145_s11, %s3146_s12  }
  0x6e   : > { %s3007_s27 = scalar_lea.hbm %s3677_s8, 16 }
  0x6f   : > { %p3008_p3 = scmp.ne.s32.totalorder %s3677_s8, %s3007_s27  ;;  %p3014_p12 = scmp.lt.u32.totalorder %s3007_s27, %s3677_s8 }
  0x71   : > { %p3010_p8 = pnand %p3008_p3, %p3329_p2 }
  0x73   : > { %p3011_p10 = pneg %p3010_p8 }
  0x75   : > { %p3016_p1 = pnand %p3014_p12, %p3011_p10 }
  0x77   : > { %3019 = shalt.err (!%p3016_p1)
}
  0x78   : > { %s3020_s25 = scalar_lea.vmem %s415_s21, 16  ;;  %s3027_s11 = scalar_lea.vmem %s415_s21, 32 }
  0x79   : > { %p3021_p4 = scmp.ne.s32.totalorder %s415_s21, %s3020_s25  ;;  %p3028_p7 = scmp.lt.s32.totalorder %s415_s21, %s415_s21 }
  0x7a   : > { %p3029_p9 = scmp.lt.s32.totalorder %s3027_s11, %s3020_s25 }
  0x7b   : > { %p3023_p5 = pnand %p3021_p4, %p3329_p2 }
  0x7c   : > { %p3030_p11 = por %p3029_p9, %p3028_p7 }
  0x7d   : > { %p3024_p6 = pneg %p3023_p5 }
  0x7f   : > { %p3031_p13 = pnand %p3030_p11, %p3024_p6 }
  0x81   : > { %3034 = shalt.err (!%p3031_p13)
}
  0x82   : > { %2804 = dma.hbm_to_vmem [thread:$0]  (!%p3317_p0), %s3677_s8, 16, %s415_s21, [#allocation11]  }
  0x83   : > { %p3722_p3 = scmp.ne.s32.totalorder %s3716_s18, 0 }
  0x84   : > { %p3723_p8 = scmp.ne.s32.totalorder (!%p3722_p3), %s3717_s30, 0 }
  0x85   : > { %447 = sbr.rel (%p3722_p3) target bundleno = 2916 (0xb64), region = 72 }
  0x8c   : > { %3096 = dma.done.wait (%p3723_p8), [#allocation5], 512  }
  0x8d   : > { %3098 = vsyncadd (%p3723_p8), [#allocation5], 4294966784 }
  0x8e   : > { %3100 = dma.done.wait (%p3723_p8), [#allocation8], 528  }
  0x8f   : > { %3102 = vsyncadd (%p3723_p8), [#allocation8], 4294966768 }
  0x90   : > { %3104 = dma.done.wait (%p3723_p8), [#allocation11], 16  }
  0x91   : > { %3106 = vsyncadd (%p3723_p8), [#allocation11], 4294967280  ;;  %s500_s18 = sand.u32 1, %s3117_s26   ;;  %p503_p0 = scmp.lt.s32.totalorder %s3129_s29, 1 }
  0x92   : > { %s3417_s23 = sshll.u32 %s500_s18, 3  ;;  %p2519_p2 = scmp.ne.s32.totalorder %s3125_s28, 0 }
  0x93   : > { %s504_s20 = scalar_select %p503_p0, %s3129_s29, 1 }
  0x94   : > { %s502_s22 = scalar_lea.vmem [#allocation12], %s3417_s23  ;;  %511 = sbr.rel (%p2519_p2) target bundleno = 670 (0x29e), region = 92  ;;  %v514_v0 = vld [vmem:[%s3671_s2] sm:$0xff] (!%p2519_p2)  ;;  %v515_v1 = vld [vmem:[%s3671_s2 + $0x8] sm:$0xff] (!%p2519_p2)  ;;  %v516_v2 = vld [vmem:[%s3671_s2 + $0x10] sm:$0xff] (!%p2519_p2)  ;;  %vm518_vm0 = vcmask (!%p2519_p2), 261120   ;;  %v680_v19 = vlaneseq (!%p2519_p2) }
  0x95   : > { %s2556_s21 = sshll.u32 %s504_s20, 4  ;;  %v2730_v3 = vpack.c.bf16 (!%p2519_p2), %v515_v1, %v514_v0  ;;  %v517_v4 = vld [vmem:[%s3671_s2 + $0x18] sm:$0xff] (!%p2519_p2)  ;;  %s3149_s25 = smov (!%p2519_p2), 112   ;;  %v3153_v17 = vmov (!%p2519_p2), 1983009808   ;;  %vm947_vm1 = vcmask (!%p2519_p2), 64512  }
  0x96   : > { %s3423_s6 = scalar_lea.vmem %s3669_s0, %s2556_s21  ;;  %v2734_v6 = vpack.c.bf16 (!%p2519_p2), %v517_v4, %v516_v2  ;;  %s3150_s11 = smov (!%p2519_p2), 120   ;;  %v678_v18 = vunpack.c.l.s4 (!%p2519_p2), %v3153_v17  ;;  %v3154_v22 = vmov (!%p2519_p2), 1934713408   ;;  %v681_v25 = vshrl.u32 (!%p2519_p2), %v680_v19, 7 }
  0x97   : > { %v512_v5 = vld [vmem:[%s3423_s6] sm:$0xff] (!%p2519_p2)  ;;  %2731 = vmatprep.subr.bf16.mxu0 (!%p2519_p2), %v2730_v3  ;;  %v513_v7 = vld [vmem:[%s3423_s6 + $0x8] sm:$0xff] (!%p2519_p2)  ;;  %s3151_s12 = smov (!%p2519_p2), 104   ;;  %s3152_s13 = smov (!%p2519_p2), 96   ;;  %v710_v23 = vunpack.c.l.s4 (!%p2519_p2), %v3154_v22  ;;  %vm632_vm2 = vcmask (!%p2519_p2), 130048  }
  0x98   : > { %2618 = vmatprep.mubr.msk.f32.mxu0 (!%p2519_p2), %vm518_vm0, %v512_v5  ;;  %2733 = vmatpush3.bf16.msra.mxu0 (!%p2519_p2), %v2730_v3  ;;  %v679_v24 = vunpack.c.0.s8 (!%p2519_p2), %v678_v18 }
  0x99   : > { %2735 = vmatprep.subr.bf16.mxu0 (!%p2519_p2), %v2734_v6  ;;  %v711_v28 = vunpack.c.0.s8 (!%p2519_p2), %v710_v23 }
  0x9a   : > { %v682_v29 = vsub.s32 (!%p2519_p2), %v679_v24, %v681_v25 }
  0x9b   : > { %v3441_v36 = vsub.s32 %v711_v28, %v681_v25 }
  0x9c   : > { %2737 = vmatpush3.bf16.msra.mxu0 %v2734_v6 }
  0x9f   : > { %2619 = vmatmul.mubr.msk.f32.vlgmr.msra.gmra.mrb[0].mxu0 %vm518_vm0, %v513_v7 }
 0x172   : > { %v2620_v8 = vpop.f32.mrb[0].mxu0 }
 0x173   : > { %645 = vrot.lane.b32.xlu1 %v2620_v8, %s3149_s25  ;;  %641 = vrot.lane.b32.xlu0 %v2620_v8, %s3150_s11  ;;  %v591_v9 = vpop.f32.mrb[1].mxu0 }
 0x177   : > { %643 = vrot.lane.b32.xlu1 %v591_v9, %s3149_s25  ;;  %639 = vrot.lane.b32.xlu0 %v591_v9, %s3150_s11 }
 0x17b   : > { %649 = vrot.lane.b32.xlu1 %v2620_v8, %s3151_s12  ;;  %647 = vrot.lane.b32.xlu0 %v591_v9, %s3151_s12 }
 0x17f   : > { %653 = vrot.lane.b32.xlu1 %v2620_v8, %s3152_s13  ;;  %651 = vrot.lane.b32.xlu0 %v591_v9, %s3152_s13 }
 0x1e5   : > { %v646_v10 = vpop.permute.xlu1 %645  ;;  %v642_v11 = vpop.permute.xlu0 %641 }
 0x1e6   : > { %657 = vrot.lane.b32.xlu1 %v642_v11, %s3152_s13 }
 0x1e9   : > { %v644_v12 = vpop.permute.xlu1 %643  ;;  %v640_v13 = vpop.permute.xlu0 %639 }
 0x1ea   : > { %661 = vrot.lane.b32.xlu1 %v646_v10, %s3152_s13  ;;  %655 = vrot.lane.b32.xlu0 %v640_v13, %s3152_s13 }
 0x1ed   : > { %v650_v14 = vpop.permute.xlu1 %649  ;;  %v648_v15 = vpop.permute.xlu0 %647 }
 0x1ee   : > { %665 = vrot.lane.b32.xlu1 %v650_v14, %s3152_s13  ;;  %659 = vrot.lane.b32.xlu0 %v644_v12, %s3152_s13 }
 0x1f1   : > { %v654_v16 = vpop.permute.xlu1 %653  ;;  %v652_v20 = vpop.permute.xlu0 %651 }
 0x1f2   : > { %663 = vrot.lane.b32.xlu0 %v648_v15, %s3152_s13 }
 0x210   : > { %600 = vxpose.xlu0.b32.start [1/2] (short) (narrow) %v591_v9, 32 }
 0x214   : > { %601 = vxpose.xlu0.b32.end [2/2] (short) (narrow) %v2620_v8, 32 }
 0x258   : > { %v658_v21 = vpop.permute.xlu1 %657 }
 0x25c   : > { %v662_v26 = vpop.permute.xlu1 %661  ;;  %v656_v27 = vpop.permute.xlu0 %655 }
 0x25d   : > { %v743_v30 = vcombine.low %v654_v16, %v662_v26  ;;  %v744_v31 = vcombine.high %v654_v16, %v662_v26 }
 0x25f   : > { %v751_v37 = vrot.slane %v743_v30, %v682_v29  ;;  %v758_v38 = vrot.slane %v744_v31, %v682_v29 }
 0x260   : > { %v666_v32 = vpop.permute.xlu1 %665  ;;  %v660_v33 = vpop.permute.xlu0 %659 }
 0x261   : > { %v759_v34 = vcombine.low %v658_v21, %v666_v32  ;;  %v760_v35 = vcombine.high %v658_v21, %v666_v32  ;;  %v675_v41 = vcombine.low %v652_v20, %v660_v33  ;;  %v676_v42 = vcombine.high %v652_v20, %v660_v33 }
 0x263   : > { %v767_v39 = vrot.slane %v759_v34, %v682_v29  ;;  %v774_v40 = vrot.slane %v760_v35, %v682_v29  ;;  %v683_v54 = vrot.slane %v675_v41, %v682_v29  ;;  %v690_v55 = vrot.slane %v676_v42, %v682_v29 }
 0x264   : > { %v664_v43 = vpop.permute.xlu0 %663 }
 0x265   : > { %v775_v44 = vcombine.low %v751_v37, %v767_v39  ;;  %v776_v45 = vcombine.high %v751_v37, %v767_v39  ;;  %v791_v46 = vcombine.low %v758_v38, %v774_v40  ;;  %v792_v47 = vcombine.high %v758_v38, %v774_v40 }
 0x266   : > { %v691_v48 = vcombine.low %v656_v27, %v664_v43  ;;  %v692_v49 = vcombine.high %v656_v27, %v664_v43 }
 0x267   : > { %v783_v50 = vrot.slane %v775_v44, %v3441_v36  ;;  %v790_v51 = vrot.slane %v776_v45, %v3441_v36  ;;  %v799_v52 = vrot.slane %v791_v46, %v3441_v36  ;;  %v806_v53 = vrot.slane %v792_v47, %v3441_v36 }
 0x268   : > { %v699_v56 = vrot.slane %v691_v48, %v682_v29  ;;  %v706_v57 = vrot.slane %v692_v49, %v682_v29 }
 0x269   : > { %v879_v58 = vcombine.low %v783_v50, %v790_v51  ;;  %v2524_v59 = vcombine.high %v783_v50, %v790_v51  ;;  %v895_v60 = vcombine.low %v799_v52, %v806_v53  ;;  %v2525_v61 = vcombine.high %v799_v52, %v806_v53 }
 0x26a   : > { %v707_v62 = vcombine.low %v683_v54, %v699_v56  ;;  %v708_v63 = vcombine.high %v683_v54, %v699_v56  ;;  %v723_v0 = vcombine.low %v690_v55, %v706_v57  ;;  %v724_v1 = vcombine.high %v690_v55, %v706_v57 }
 0x26b   : > { %v886_v2 = vrot.slane %v879_v58, %v682_v29  ;;  %v894_v3 = vrot.slane %v2524_v59, %v682_v29  ;;  %v902_v4 = vrot.slane %v895_v60, %v682_v29  ;;  %v910_v5 = vrot.slane %v2525_v61, %v682_v29 }
 0x26c   : > { %v715_v6 = vrot.slane %v707_v62, %v3441_v36  ;;  %v722_v7 = vrot.slane %v708_v63, %v3441_v36  ;;  %v731_v8 = vrot.slane %v723_v0, %v3441_v36  ;;  %v738_v9 = vrot.slane %v724_v1, %v3441_v36 }
 0x26d   : > { %v911_v10 = vcombine.low %v886_v2, %v894_v3  ;;  %v912_v11 = vcombine.high %v886_v2, %v894_v3  ;;  %v927_v12 = vcombine.low %v902_v4, %v910_v5  ;;  %v928_v13 = vcombine.high %v902_v4, %v910_v5 }
 0x26e   : > { %v811_v14 = vcombine.low %v715_v6, %v722_v7  ;;  %v2522_v15 = vcombine.high %v715_v6, %v722_v7  ;;  %v827_v16 = vcombine.low %v731_v8, %v738_v9  ;;  %v2523_v17 = vcombine.high %v731_v8, %v738_v9 }
 0x26f   : > { %v919_v18 = vrot.slane %v911_v10, %v3441_v36  ;;  %v926_v19 = vrot.slane %v912_v11, %v3441_v36  ;;  %v935_v20 = vrot.slane %v927_v12, %v3441_v36  ;;  %v942_v21 = vrot.slane %v928_v13, %v3441_v36 }
 0x270   : > { %v818_v22 = vrot.slane %v811_v14, %v682_v29  ;;  %v826_v23 = vrot.slane %v2522_v15, %v682_v29  ;;  %v834_v24 = vrot.slane %v827_v16, %v682_v29  ;;  %v842_v25 = vrot.slane %v2523_v17, %v682_v29 }
 0x271   : > { %v943_v26 = vcombine.low %v919_v18, %v935_v20  ;;  %v944_v27 = vcombine.high %v919_v18, %v935_v20  ;;  %v945_v28 = vcombine.low %v926_v19, %v942_v21  ;;  %v946_v30 = vcombine.high %v926_v19, %v942_v21 }
 0x272   : > { %v843_v31 = vcombine.low %v818_v22, %v826_v23  ;;  %v844_v32 = vcombine.high %v818_v22, %v826_v23  ;;  %v859_v33 = vcombine.low %v834_v24, %v842_v25  ;;  %v860_v34 = vcombine.high %v834_v24, %v842_v25 }
 0x273   : > { %949 = vst.msk [vmem:[#allocation3 + $0x8] sm:$0xff] %vm947_vm1, %v943_v26  ;;  %951 = vst.msk [vmem:[#allocation3 + $0x18] sm:$0xff] %vm947_vm1, %v944_v27 }
 0x274   : > { %953 = vst.msk [vmem:[#allocation3 + $0x28] sm:$0xff] %vm947_vm1, %v945_v28  ;;  %955 = vst.msk [vmem:[#allocation3 + $0x38] sm:$0xff] %vm947_vm1, %v946_v30  ;;  %v851_v35 = vrot.slane %v843_v31, %v3441_v36  ;;  %v858_v29 = vrot.slane %v844_v32, %v3441_v36  ;;  %v867_v37 = vrot.slane %v859_v33, %v3441_v36 }
 0x275   : > { %v874_v38 = vrot.slane %v860_v34, %v3441_v36 }
 0x276   : > { %v875_v39 = vcombine.low %v851_v35, %v867_v37  ;;  %v876_v40 = vcombine.high %v851_v35, %v867_v37 }
 0x277   : > { %v877_v41 = vcombine.low %v858_v29, %v874_v38  ;;  %v878_v42 = vcombine.high %v858_v29, %v874_v38 }
 0x278   : > { %948 = vst.msk [vmem:[#allocation3] sm:$0xff] %vm947_vm1, %v875_v39  ;;  %950 = vst.msk [vmem:[#allocation3 + $0x10] sm:$0xff] %vm947_vm1, %v876_v40 }
 0x279   : > { %952 = vst.msk [vmem:[#allocation3 + $0x20] sm:$0xff] %vm947_vm1, %v877_v41  ;;  %954 = vst.msk [vmem:[#allocation3 + $0x30] sm:$0xff] %vm947_vm1, %v878_v42 }
 0x290   : > { %v616_v43 = vpop.trf.xlu0 }
 0x291   : > { %633 = vst.msk [vmem:[#allocation2] sm:$0xff] %vm632_vm2, %v616_v43 }
 0x294   : > { %v617_v44 = vpop.trf.xlu0 }
 0x295   : > { %634 = vst.msk [vmem:[#allocation2 + $0x8] sm:$0xff] %vm632_vm2, %v617_v44 }
 0x298   : > { %v618_v45 = vpop.trf.xlu0 }
 0x299   : > { %635 = vst.msk [vmem:[#allocation2 + $0x10] sm:$0xff] %vm632_vm2, %v618_v45 }
 0x29c   : > { %v619_v36 = vpop.trf.xlu0 }
 0x29d   : > { %636 = vst.msk [vmem:[#allocation2 + $0x18] sm:$0xff] %vm632_vm2, %v619_v36 }
 0x29e PF: > { %v959_v46 = vld [vmem:[%s3670_s1] sm:$0xff]  ;;  %v960_v47 = vld [vmem:[%s3670_s1 + $0x8] sm:$0xff]  ;;  %v961_v48 = vld [vmem:[%s3670_s1 + $0x10] sm:$0xff]  ;;  %v3155_v49 = vmov 0.0|0.0   ;;  %vm3156_vm3 = vmmov 0   ;;  %v3157_v52 = vmov 0.0   ;;  %v1052_v60 = vlaneseq }
 0x29f   : > { %2738 = vmatprep.subr.bf16.mxu0 %v3155_v49  ;;  %v2739_v50 = vpack.c.bf16 %v960_v47, %v959_v46  ;;  %v962_v51 = vld [vmem:[%s3670_s1 + $0x18] sm:$0xff]  ;;  %2629 = vmatprep.mubr.msk.f32.mxu0 %vm3156_vm3, %v3157_v52  ;;  %s2526_s15 = sshll.u32 %s3125_s28, 3  ;;  %vm963_vm4 = vcmask 261120   ;;  %s3158_s17 = smov 104   ;;  %v1183_v57 = vld [vmem:[#allocation2] sm:$0xff]  ;;  %vm1187_vm5 = vcmask 64512  }
 0x2a0   : > { %2632 = vmatprep.subr.mxu1 %v3157_v52  ;;  %2634 = vmatprep.mubr.msk.f32.mxu1 %vm3156_vm3, %v3157_v52  ;;  %v2742_v53 = vpack.c.bf16 %v962_v51, %v961_v48  ;;  %s957_s14 = scalar_lea.vmem %s3423_s6, %s2526_s15  ;;  %s3159_s19 = smov 120   ;;  %v3161_v58 = vmov 1983009808   ;;  %v3162_v61 = vmov 1934713408   ;;  %v1053_v0 = vshrl.u32 %v1052_v60, 7 }
 0x2a1   : > { %2740 = vmatpush3.bf16.msra.mxu0 %v2739_v50  ;;  %v3488_v54 = vld [vmem:[%s957_s14] sm:$0xff]  ;;  %s3160_s6 = smov 112   ;;  %2633 = vmatpush3.msra.mxu1 %v1183_v57  ;;  %v1050_v59 = vunpack.c.l.s4 %v3161_v58  ;;  %v1082_v62 = vunpack.c.l.s4 %v3162_v61  ;;  %v1184_v39 = vld [vmem:[#allocation2 + $0x8] sm:$0xff]  ;;  %v1185_v41 = vld [vmem:[#allocation2 + $0x10] sm:$0xff]  ;;  %vm1480_vm6 = vcmask 130048   ;;  %vm2267_vm7 = vcmask 523264  }
 0x2a2   : > { %2741 = vmatprep.subr.bf16.mxu0 %v3155_v49  ;;  %2637 = vmatprep.subr.mxu1 %v3157_v52  ;;  %v1517_v61 = vld [vmem:[#allocation3] sm:$0xff]  ;;  %s3725_s24 = sld [smem:[#allocation29_spill]]  ;;  %s2552_s16 = sshll.u32 %s3129_s29, 1 }
 0x2a3   : > { %v1051_v63 = vunpack.c.0.s8 %v1050_v59  ;;  %v1083_v3 = vunpack.c.0.s8 %v1082_v62  ;;  %v1518_v62 = vld [vmem:[#allocation3 + $0x8] sm:$0xff]  ;;  %s3726_s30 = sld [smem:[#allocation23_spill]]  ;;  %s2384_s5 = sadd.s32 %s3125_s28, %s2552_s16 }
 0x2a4   : > { %v1186_v45 = vld [vmem:[#allocation2 + $0x18] sm:$0xff]  ;;  %s3727_s15 = sld [smem:[#allocation30_spill]]  ;;  %s2388_s25 = sshll.u32 %s502_s22, 4  ;;  %s3613_s25 = int_to_ptr.vmem [resolvable:$true] %s2388_s25 }
 0x2a5   : > { %2743 = vmatpush3.bf16.msra.mxu0 %v2742_v53  ;;  %v1054_v4 = vsub.s32 %v1051_v63, %v1053_v0  ;;  %v1086_v10 = vsub.s32 %v1083_v3, %v1053_v0  ;;  %v2745_v63 = vpack.c.bf16 %v1518_v62, %v1517_v61  ;;  %v1519_v0 = vld [vmem:[#allocation3 + $0x10] sm:$0xff]  ;;  %s3729_s29 = sld [smem:[#allocation32_spill]]  ;;  %s2373_s28 = scalar_lea.sflag [#allocation6], %s500_s18 }
 0x2a6   : > { %2747 = vmatprep.subr.bf16.mxu0 %v3155_v49  ;;  %s3035_s21 = scalar_lea.vmem %s3613_s25, 128 }
 0x2a7   : > { %p3036_p10 = scmp.ne.s32.totalorder %s3613_s25, %s3035_s21 }
 0x2a8   : > { %2630 = vmatmul.mubr.msk.f32.vlgmr.msra.gmra.mrb[0].mxu0 %vm963_vm4, %v3488_v54 }
 0x2a9   : > { %2663 = vmatprep.mubr.msk.f32.mxu0 %vm3156_vm3, %v3157_v52  ;;  %p3731_p12 = scmp.ne.s32.totalorder %s3726_s30, 0 }
 0x2ab   : > { %s3730_s13 = smov %s3729_s29  ;;  %p3037_p1 = pnand %p3036_p10, %p3731_p12 }
 0x2ad   : > { %p3038_p4 = pneg %p3037_p1 }
 0x37b   : > { %v1033_v55 = vpop.f32.mrb[0].mxu0 }
 0x37c   : > { %1044 = vrot.lane.b32.xlu1 %v1033_v55, %s3158_s17  ;;  %1038 = vrot.lane.b32.xlu0 %v1033_v55, %s3159_s19  ;;  %v2631_v56 = vpop.f32.mrb[1].mxu0  ;;  %s3728_s19 = sld [smem:[#allocation31_spill]] }
 0x380   : > { %1041 = vrot.lane.b32.xlu0 %v1033_v55, %s3160_s6  ;;  %s3724_s6 = sld [smem:[#allocation27_spill]] }
 0x3ee   : > { %v1045_v1 = vpop.permute.xlu1 %1044  ;;  %v1039_v2 = vpop.permute.xlu0 %1038 }
 0x3ef   : > { %v1063_v5 = vcombine.low %v1039_v2, %v1045_v1  ;;  %v1064_v6 = vcombine.high %v1039_v2, %v1045_v1  ;;  %v1520_v1 = vld [vmem:[#allocation3 + $0x18] sm:$0xff] }
 0x3f0   : > { %v2748_v2 = vpack.c.bf16 %v1520_v1, %v1519_v0 }
 0x3f1   : > { %v1071_v11 = vrot.slane %v1063_v5, %v1054_v4  ;;  %v1078_v12 = vrot.slane %v1064_v6, %v1054_v4 }
 0x3f2   : > { %v1042_v7 = vpop.permute.xlu0 %1041  ;;  %2749 = vmatpush3.bf16.msra.mxu0 %v2748_v2 }
 0x3f3   : > { %v1047_v8 = vcombine.low %v1033_v55, %v1042_v7  ;;  %v1048_v9 = vcombine.high %v1033_v55, %v1042_v7  ;;  %2753 = vmatprep.subr.bf16.mxu0 %v3155_v49 }
 0x3f5   : > { %v1055_v13 = vrot.slane %v1047_v8, %v1054_v4  ;;  %v1062_v14 = vrot.slane %v1048_v9, %v1054_v4 }
 0x3f7   : > { %v1079_v15 = vcombine.low %v1055_v13, %v1071_v11  ;;  %v1080_v16 = vcombine.high %v1055_v13, %v1071_v11  ;;  %v1095_v17 = vcombine.low %v1062_v14, %v1078_v12  ;;  %v1096_v18 = vcombine.high %v1062_v14, %v1078_v12  ;;  %v1521_v11 = vld [vmem:[#allocation3 + $0x20] sm:$0xff]  ;;  %v1522_v12 = vld [vmem:[#allocation3 + $0x28] sm:$0xff] }
 0x3f9   : > { %v1087_v19 = vrot.slane %v1079_v15, %v1086_v10  ;;  %v1094_v20 = vrot.slane %v1080_v16, %v1086_v10  ;;  %v1103_v21 = vrot.slane %v1095_v17, %v1086_v10  ;;  %v1110_v22 = vrot.slane %v1096_v18, %v1086_v10  ;;  %v1523_v17 = vld [vmem:[#allocation3 + $0x30] sm:$0xff]  ;;  %v1524_v18 = vld [vmem:[#allocation3 + $0x38] sm:$0xff] }
 0x3fa   : > { %v2751_v16 = vpack.c.bf16 %v1522_v12, %v1521_v11 }
 0x3fb   : > { %v1115_v23 = vcombine.low %v1087_v19, %v1094_v20  ;;  %v2528_v24 = vcombine.high %v1087_v19, %v1094_v20  ;;  %v1131_v25 = vcombine.low %v1103_v21, %v1110_v22  ;;  %v2529_v26 = vcombine.high %v1103_v21, %v1110_v22 }
 0x3fc   : > { %v2754_v22 = vpack.c.bf16 %v1524_v18, %v1523_v17  ;;  %v2169_v18 = vld [vmem:[#allocation9 + $0x10] sm:$0xff] }
 0x3fd   : > { %v1122_v27 = vrot.slane %v1115_v23, %v1054_v4  ;;  %v1130_v28 = vrot.slane %v2528_v24, %v1054_v4  ;;  %v1138_v30 = vrot.slane %v1131_v25, %v1054_v4  ;;  %v1146_v31 = vrot.slane %v2529_v26, %v1054_v4 }
 0x3ff   : > { %v1147_v32 = vcombine.low %v1122_v27, %v1130_v28  ;;  %v1163_v33 = vcombine.low %v1138_v30, %v1146_v31  ;;  %v1148_v29 = vcombine.high %v1122_v27, %v1130_v28  ;;  %v1164_v37 = vcombine.high %v1138_v30, %v1146_v31  ;;  %v1825_v30 = vld [vmem:[#allocation4] sm:$0xff]  ;;  %v1826_v31 = vld [vmem:[#allocation4 + $0x8] sm:$0xff] }
 0x401   : > { %v1155_v34 = vrot.slane %v1147_v32, %v1086_v10  ;;  %v1171_v35 = vrot.slane %v1163_v33, %v1086_v10  ;;  %v1162_v42 = vrot.slane %v1148_v29, %v1086_v10  ;;  %v1178_v43 = vrot.slane %v1164_v37, %v1086_v10 }
 0x403   : > { %v1179_v38 = vcombine.low %v1155_v34, %v1171_v35  ;;  %v1180_v40 = vcombine.high %v1155_v34, %v1171_v35  ;;  %v1181_v44 = vcombine.low %v1162_v42, %v1178_v43  ;;  %v1182_v36 = vcombine.high %v1162_v42, %v1178_v43 }
 0x405   : > { %2635 = vmatmul.mubr.msk.f32.vlgmr.msra.gmra.mrb[0].mxu1 %vm1187_vm5, %v1179_v38 }
 0x406   : > { %2638 = vmatpush3.msra.mxu1 %v1184_v39  ;;  %2639 = vmatprep.mubr.msk.f32.mxu1 %vm3156_vm3, %v3157_v52 }
 0x407   : > { %2642 = vmatprep.subr.mxu1 %v3157_v52 }
 0x409   : > { %2640 = vmatmul.mubr.msk.f32.vlgmr.msra.gmra.mrb[2].mxu1 %vm1187_vm5, %v1180_v40  ;;  %v1827_v40 = vld [vmem:[#allocation4 + $0x10] sm:$0xff] }
 0x40a   : > { %2643 = vmatpush3.msra.mxu1 %v1185_v41  ;;  %2644 = vmatprep.mubr.msk.f32.mxu1 %vm3156_vm3, %v3157_v52 }
 0x40b   : > { %2647 = vmatprep.subr.mxu1 %v3157_v52 }
 0x40d   : > { %2645 = vmatmul.mubr.msk.f32.vlgmr.msra.gmra.mrb[4].mxu1 %vm1187_vm5, %v1181_v44 }
 0x40e   : > { %2648 = vmatpush3.msra.mxu1 %v1186_v45  ;;  %2649 = vmatprep.mubr.msk.f32.mxu1 %vm3156_vm3, %v3157_v52  ;;  %v1828_v45 = vld [vmem:[#allocation4 + $0x18] sm:$0xff] }
 0x40f   : > { %2744 = vmatprep.subr.bf16.mxu1 %v3155_v49 }
 0x411   : > { %2650 = vmatmul.mubr.msk.f32.vlgmr.msra.gmra.mrb[6].mxu1 %vm1187_vm5, %v1182_v36 }
 0x412   : > { %2656 = vmatprep.mubr.msk.f32.mxu1 %vm3156_vm3, %v3157_v52  ;;  %2746 = vmatpush3.bf16.msra.mxu1 %v2745_v63 }
 0x413   : > { %2750 = vmatprep.subr.bf16.mxu1 %v3155_v49 }
 0x4d8   : > { %v1257_v46 = vpop.f32.mrb[0].mxu1 }
 0x4d9   : > { %v2636_v47 = vpop.f32.mrb[1].mxu1  ;;  %v1481_v48 = vsel %vm1480_vm6, %v1257_v46, -inf }
 0x4da   : > { %1482 = vmax.xlane.f32.xlu1 %v1481_v48 }
 0x4dc   : > { %v1330_v50 = vpop.f32.mrb[2].mxu1 }
 0x4dd   : > { %v2641_v51 = vpop.f32.mrb[3].mxu1  ;;  %v1484_v53 = vsel %vm1480_vm6, %v1330_v50, -inf }
 0x4de   : > { %1485 = vmax.xlane.f32.xlu0 %v1484_v53 }
 0x4e0   : > { %v1403_v55 = vpop.f32.mrb[4].mxu1 }
 0x4e1   : > { %v2646_v56 = vpop.f32.mrb[5].mxu1  ;;  %v1487_v57 = vsel %vm1480_vm6, %v1403_v55, -inf }
 0x4e2   : > { %1488 = vmax.xlane.f32.xlu0 %v1487_v57 }
 0x4e4   : > { %v1476_v58 = vpop.f32.mrb[6].mxu1 }
 0x4e5   : > { %v2651_v59 = vpop.f32.mrb[7].mxu1  ;;  %v1490_v60 = vsel %vm1480_vm6, %v1476_v58, -inf }
 0x4e6   : > { %1491 = vmax.xlane.f32.xlu1 %v1490_v60 }
 0x567   : > { %v1483_v3 = vpop.xlane.xlu1 %1482 }
 0x568   : > { %v1493_v4 = vsub.f32 %v1257_v46, %v1483_v3 }
 0x56a   : > { %v1497_v5 = vmul.f32 1.442695, %v1493_v4 }
 0x56b   : > { %v1486_v6 = vpop.xlane.xlu0 %1485 }
 0x56c   : > { %2903 = vpow2.f32 %v1497_v5  ;;  %v1494_v7 = vsub.f32 %v1330_v50, %v1486_v6 }
 0x56e   : > { %v1499_v8 = vmul.f32 1.442695, %v1494_v7 }
 0x56f   : > { %v1489_v9 = vpop.xlane.xlu0 %1488 }
 0x570   : > { %2905 = vpow2.f32 %v1499_v8  ;;  %v1495_v10 = vsub.f32 %v1403_v55, %v1489_v9 }
 0x572   : > { %v1501_v13 = vmul.f32 1.442695, %v1495_v10 }
 0x573   : > { %v1492_v14 = vpop.xlane.xlu1 %1491 }
 0x574   : > { %2907 = vpow2.f32 %v1501_v13  ;;  %v1496_v15 = vsub.f32 %v1476_v58, %v1492_v14 }
 0x576   : > { %v2904_v19 = vpop.eup %2903  ;;  %v1503_v20 = vmul.f32 1.442695, %v1496_v15  ;;  %v2167_v15 = vld [vmem:[#allocation9] sm:$0xff] }
 0x577   : > { %2657 = vmatmul.mubr.msk.f32.vlgmr.msra.gmra.mrb[8].mxu1 %vm1480_vm6, %v2904_v19  ;;  %v1505_v21 = vsel %vm1480_vm6, %v2904_v19, 0.0  ;;  %v2170_v19 = vld [vmem:[#allocation9 + $0x18] sm:$0xff] }
 0x578   : > { %2909 = vpow2.f32 %v1503_v20  ;;  %1506 = vadd.xlane.f32.xlu0 %v1505_v21  ;;  %2752 = vmatpush3.bf16.msra.mxu1 %v2751_v16  ;;  %v2168_v16 = vld [vmem:[#allocation9 + $0x8] sm:$0xff]  ;;  %v2760_v20 = vpack.c.bf16 %v2170_v19, %v2169_v18 }
 0x579   : > { %2670 = vmatprep.mubr.msk.f32.mxu1 %vm3156_vm3, %v3157_v52  ;;  %2680 = vmatprep.subr.mxu1 %v3157_v52  ;;  %v2757_v17 = vpack.c.bf16 %v2168_v16, %v2167_v15  ;;  %v2253_v21 = vld [vmem:[%s3678_s9 + $0x8] sm:$0xff] }
 0x57a   : > { %v2906_v23 = vpop.eup %2905 }
 0x57b   : > { %2664 = vmatmul.mubr.msk.f32.vlgmr.msra.gmra.mrb[2].mxu0 %vm1480_vm6, %v2906_v23  ;;  %v1508_v24 = vsel %vm1480_vm6, %v2906_v23, 0.0 }
 0x57c   : > { %1509 = vadd.xlane.f32.xlu1 %v1508_v24  ;;  %2755 = vmatpush3.bf16.msra.mxu0 %v2754_v22  ;;  %v2254_v22 = vld [vmem:[%s3678_s9 + $0x10] sm:$0xff]  ;;  %v2255_v24 = vld [vmem:[%s3678_s9 + $0x18] sm:$0xff] }
 0x57d   : > { %2677 = vmatprep.mubr.msk.f32.mxu0 %vm3156_vm3, %v3157_v52  ;;  %2685 = vmatprep.subr.mxu0 %v3157_v52 }
 0x57e   : > { %v2908_v25 = vpop.eup %2907 }
 0x57f   : > { %2671 = vmatmul.mubr.msk.f32.vlgmr.msra.gmra.mrb[10].mxu1 %vm1480_vm6, %v2908_v25  ;;  %v1511_v26 = vsel %vm1480_vm6, %v2908_v25, 0.0  ;;  %v2766_v25 = vpack.c.bf16 %v2255_v24, %v2254_v22 }
 0x580   : > { %1512 = vadd.xlane.f32.xlu0 %v1511_v26  ;;  %2682 = vmatprep.mubr.msk.f32.mxu1 %vm3156_vm3, %v3157_v52  ;;  %v2256_v26 = vld [vmem:[%s3678_s9 + $0x20] sm:$0xff] }
 0x581   : > { %2681 = vmatpush3.msra.mxu1 %v1825_v30 }
 0x582   : > { %v2910_v27 = vpop.eup %2909  ;;  %2690 = vmatprep.subr.mxu1 %v3157_v52 }
 0x583   : > { %2678 = vmatmul.mubr.msk.f32.vlgmr.msra.gmra.mrb[4].mxu0 %vm1480_vm6, %v2910_v27  ;;  %v1514_v28 = vsel %vm1480_vm6, %v2910_v27, 0.0  ;;  %v2257_v27 = vld [vmem:[%s3678_s9 + $0x28] sm:$0xff] }
 0x584   : > { %1515 = vadd.xlane.f32.xlu1 %v1514_v28  ;;  %2687 = vmatprep.mubr.msk.f32.mxu0 %vm3156_vm3, %v3157_v52  ;;  %v2769_v28 = vpack.c.bf16 %v2257_v27, %v2256_v26 }
 0x585   : > { %2686 = vmatpush3.msra.mxu0 %v1826_v31 }
 0x586   : > { %2695 = vmatprep.subr.mxu0 %v3157_v52 }
 0x605   : > { %v1507_v32 = vpop.xlane.xlu0 %1506 }
 0x606   : > { %2911 = vrcp.f32 %v1507_v32 }
 0x609   : > { %v1510_v33 = vpop.xlane.xlu1 %1509 }
 0x60a   : > { %2913 = vrcp.f32 %v1510_v33 }
 0x60d   : > { %v1513_v34 = vpop.xlane.xlu0 %1512 }
 0x60e   : > { %2915 = vrcp.f32 %v1513_v34  ;;  %v2543_v34 = vld [vmem:[%s3724_s6] ss:$0 sm:$0xff]  ;;  %s2553_s6 = sshll.u32 %s2384_s5, 7 }
 0x60f   : > { %s3611_s20 = scalar_lea.hbm %s3729_s29, %s2553_s6 }
 0x610   : > { %v2912_v29 = vpop.eup %2911 }
 0x611   : > { %v1516_v35 = vpop.xlane.xlu1 %1515 }
 0x612   : > { %2917 = vrcp.f32 %v1516_v35 }
 0x614   : > { %v2914_v41 = vpop.eup %2913 }
 0x618   : > { %v2916_v36 = vpop.eup %2915 }
 0x61c   : > { %v2918_v50 = vpop.eup %2917 }
 0x64a   : > { %v1594_v37 = vpop.f32.mrb[8].mxu1 }
 0x64b   : > { %v1821_v38 = vmul.f32 %v2912_v29, %v1594_v37  ;;  %v2658_v39 = vpop.f32.mrb[9].mxu1  ;;  %v2544_v29 = vld [vmem:[#allocation7] ss:$0 sm:$0xff] }
 0x64c   : > { %v2258_v39 = vld [vmem:[%s3678_s9 + $0x30] sm:$0xff] }
 0x64d   : > { %2683 = vmatmul.mubr.msk.f32.vlgmr.msra.gmra.mrb[12].mxu1 %vm1187_vm5, %v1821_v38 }
 0x64e   : > { %v1667_v42 = vpop.f32.mrb[2].mxu0  ;;  %2691 = vmatpush3.msra.mxu1 %v1827_v40  ;;  %2692 = vmatprep.mubr.msk.f32.mxu1 %vm3156_vm3, %v3157_v52 }
 0x64f   : > { %v1822_v43 = vmul.f32 %v2914_v41, %v1667_v42  ;;  %v2665_v44 = vpop.f32.mrb[3].mxu0  ;;  %2756 = vmatprep.subr.bf16.mxu1 %v3155_v49  ;;  %v2545_v41 = vld [vmem:[#allocation10] ss:$0 sm:$0xff] }
 0x651   : > { %2688 = vmatmul.mubr.msk.f32.vlgmr.msra.gmra.mrb[6].mxu0 %vm1187_vm5, %v1822_v43 }
 0x652   : > { %v1740_v46 = vpop.f32.mrb[10].mxu1  ;;  %2696 = vmatpush3.msra.mxu0 %v1828_v45  ;;  %2697 = vmatprep.mubr.msk.f32.mxu0 %vm3156_vm3, %v3157_v52 }
 0x653   : > { %v1823_v47 = vmul.f32 %v2916_v36, %v1740_v46  ;;  %v2672_v48 = vpop.f32.mrb[11].mxu1  ;;  %2762 = vmatprep.subr.bf16.mxu0 %v3155_v49  ;;  %v2547_v36 = vld [vmem:[%s3725_s24] ss:$0 sm:$0xff]  ;;  %s3163_s24 = smov [#allocation12]  }
 0x654   : > { %s3039_s16 = sshll.u32 %s3163_s24, 4  ;;  %s3040_s16 = int_to_ptr.vmem [resolvable:$false] %s3039_s16 }
 0x655   : > { %2693 = vmatmul.mubr.msk.f32.vlgmr.msra.gmra.mrb[14].mxu1 %vm1187_vm5, %v1823_v47  ;;  %s3041_s5 = scalar_lea.vmem %s3040_s16, 256  ;;  %p3042_p5 = scmp.lt.s32.totalorder %s3613_s25, %s3040_s16 }
 0x656   : > { %v1813_v51 = vpop.f32.mrb[4].mxu0  ;;  %2708 = vmatprep.mubr.msk.f32.mxu1 %vm3156_vm3, %v3157_v52  ;;  %2758 = vmatpush3.bf16.msra.mxu1 %v2757_v17  ;;  %p3043_p6 = scmp.lt.s32.totalorder %s3041_s5, %s3035_s21 }
 0x657   : > { %v1824_v53 = vmul.f32 %v2918_v50, %v1813_v51  ;;  %v2679_v55 = vpop.f32.mrb[5].mxu0  ;;  %2759 = vmatprep.subr.bf16.mxu1 %v3155_v49 }
 0x658   : > { %p3044_p7 = por %p3043_p6, %p3042_p5 }
 0x659   : > { %2698 = vmatmul.mubr.msk.f32.vlgmr.msra.gmra.mrb[8].mxu0 %vm1187_vm5, %v1824_v53 }
 0x65a   : > { %2727 = vmatprep.mubr.msk.f32.mxu0 %vm3156_vm3, %v3157_v52  ;;  %v2542_v52 = vld [vmem:[%s3673_s4] ss:$0 sm:$0xff]  ;;  %2761 = vmatpush3.bf16.msra.mxu1 %v2760_v20  ;;  %p3045_p9 = pnand %p3044_p7, %p3038_p4 }
 0x720   : > { %v1898_v56 = vpop.f32.mrb[12].mxu1 }
 0x721   : > { %v2684_v57 = vpop.f32.mrb[13].mxu1  ;;  %v2121_v59 = vsel %vm963_vm4, %v1898_v56, 0.0 }
 0x724   : > { %v1971_v58 = vpop.f32.mrb[6].mxu0 }
 0x725   : > { %v2122_v60 = vsel %vm963_vm4, %v1971_v58, 0.0  ;;  %v2689_v61 = vpop.f32.mrb[7].mxu0 }
 0x726   : > { %v2123_v62 = vadd.f32 %v2122_v60, %v2121_v59 }
 0x728   : > { %v2044_v63 = vpop.f32.mrb[14].mxu1 }
 0x729   : > { %v2124_v0 = vsel %vm963_vm4, %v2044_v63, 0.0  ;;  %v2694_v1 = vpop.f32.mrb[15].mxu1  ;;  %v2549_v63 = vld [vmem:[%s3727_s15] ss:$0 sm:$0xff] }
 0x72a   : > { %v2125_v2 = vadd.f32 %v2124_v0, %v2123_v62  ;;  %v2550_v1 = vld [vmem:[%s3728_s19] ss:$0 sm:$0xff] }
 0x72c   : > { %v2117_v3 = vpop.f32.mrb[8].mxu0 }
 0x72d   : > { %v2126_v4 = vsel %vm963_vm4, %v2117_v3, 0.0  ;;  %v2699_v5 = vpop.f32.mrb[9].mxu0 }
 0x72e   : > { %v2127_v6 = vadd.f32 %v2126_v4, %v2125_v2 }
 0x730   : > { %v2135_v7 = vadd.f32 %v2542_v52, %v2127_v6 }
 0x732   : > { %v2136_v8 = vadd.f32 %v2135_v7, %v3488_v54  ;;  %v2252_v54 = vld [vmem:[%s3678_s9] sm:$0xff] }
 0x733   : > { %v2763_v23 = vpack.c.bf16 %v2253_v21, %v2252_v54 }
 0x734   : > { %v2139_v9 = vsel %vm963_vm4, %v2136_v8, 0.0 }
 0x735   : > { %2140 = vadd.xlane.f32.xlu0 %v2139_v9  ;;  %2764 = vmatpush3.bf16.msra.mxu0 %v2763_v23 }
 0x736   : > { %2765 = vmatprep.subr.bf16.mxu0 %v3155_v49 }
 0x739   : > { %2767 = vmatpush3.bf16.msra.mxu0 %v2766_v25 }
 0x73a   : > { %2768 = vmatprep.subr.bf16.mxu0 %v3155_v49 }
 0x73d   : > { %2770 = vmatpush3.bf16.msra.mxu0 %v2769_v28 }
 0x73e   : > { %2771 = vmatprep.subr.bf16.mxu0 %v3155_v49  ;;  %v2259_v49 = vld [vmem:[%s3678_s9 + $0x38] sm:$0xff] }
 0x73f   : > { %v2772_v40 = vpack.c.bf16 %v2259_v49, %v2258_v39 }
 0x741   : > { %2773 = vmatpush3.bf16.msra.mxu0 %v2772_v40 }
 0x7c2   : > { %v2141_v10 = vpop.xlane.xlu0 %2140 }
 0x7c3   : > { %v2143_v11 = vmul.f32 0.03125, %v2141_v10 }
 0x7c5   : > { %v2144_v12 = vsub.f32 %v2136_v8, %v2143_v11 }
 0x7c7   : > { %v2145_v13 = vmul.f32 %v2144_v12, %v2144_v12 }
 0x7c9   : > { %v2146_v14 = vsel %vm963_vm4, %v2145_v13, 0.0 }
 0x7ca   : > { %2147 = vadd.xlane.f32.xlu1 %v2146_v14 }
 0x857   : > { %v2148_v30 = vpop.xlane.xlu1 %2147 }
 0x858   : > { %v2149_v31 = vmul.f32 0.03125, %v2148_v30 }
 0x85a   : > { %v2150_v32 = vadd.f32 1e-06, %v2149_v31 }
 0x85c   : > { %2919 = vrsqrt.f32 %v2150_v32 }
 0x866   : > { %v2920_v33 = vpop.eup %2919 }
 0x867   : > { %v2152_v35 = vmul.f32 %v2920_v33, %v2144_v12 }
 0x869   : > { %v2159_v37 = vmul.f32 %v2543_v34, %v2152_v35 }
 0x86b   : > { %v2166_v38 = vadd.f32 %v2544_v29, %v2159_v37 }
 0x86d   : > { %2709 = vmatmul.mubr.msk.f32.vlgmr.msra.gmra.mrb[16].mxu1 %vm963_vm4, %v2166_v38 }
 0x940   : > { %v2247_v42 = vpop.f32.mrb[16].mxu1 }
 0x941   : > { %v2248_v43 = vadd.f32 %v2545_v41, %v2247_v42  ;;  %v2710_v44 = vpop.f32.mrb[17].mxu1 }
 0x943   : > { %v2251_v45 = vmax.f32 %v2248_v43, 0.0 }
 0x945   : > { %2728 = vmatmul.mubr.msk.f32.vlgmr.msra.gmra.mrb[10].mxu0 %vm2267_vm7, %v2251_v45 }
 0xa18   : > { %v2337_v46 = vpop.f32.mrb[10].mxu0 }
 0xa19   : > { %v2338_v47 = vadd.f32 %v2547_v36, %v2337_v46  ;;  %v2729_v48 = vpop.f32.mrb[11].mxu0 }
 0xa1b   : > { %v2341_v50 = vadd.f32 %v2338_v47, %v2166_v38 }
 0xa1d   : > { %v2344_v51 = vsel %vm963_vm4, %v2341_v50, 0.0 }
 0xa1e   : > { %2345 = vadd.xlane.f32.xlu0 %v2344_v51 }
 0xaab   : > { %v2346_v53 = vpop.xlane.xlu0 %2345 }
 0xaac   : > { %v2347_v55 = vmul.f32 0.03125, %v2346_v53 }
 0xaae   : > { %v2348_v56 = vsub.f32 %v2341_v50, %v2347_v55 }
 0xab0   : > { %v2349_v57 = vmul.f32 %v2348_v56, %v2348_v56 }
 0xab2   : > { %v2350_v58 = vsel %vm963_vm4, %v2349_v57, 0.0 }
 0xab3   : > { %2351 = vadd.xlane.f32.xlu1 %v2350_v58 }
 0xb40   : > { %v2352_v59 = vpop.xlane.xlu1 %2351 }
 0xb41   : > { %v2353_v60 = vmul.f32 0.03125, %v2352_v59 }
 0xb43   : > { %v2354_v61 = vadd.f32 1e-06, %v2353_v60 }
 0xb45   : > { %2921 = vrsqrt.f32 %v2354_v61 }
 0xb4f   : > { %v2922_v62 = vpop.eup %2921 }
 0xb50   : > { %v2356_v0 = vmul.f32 %v2922_v62, %v2348_v56 }
 0xb52   : > { %v2363_v2 = vmul.f32 %v2549_v63, %v2356_v0 }
 0xb54   : > { %v2370_v3 = vadd.f32 %v2550_v1, %v2363_v2 }
 0xb56   : > { %2371 = vst.msk [vmem:[%s502_s22] sm:$0xff] %vm963_vm4, %v2370_v3 }
 0xb57   : > { %3048 = shalt.err (!%p3045_p9)
}
 0xb58   : > { %s3049_s18 = scalar_lea.hbm %s3611_s20, 128  ;;  %s3053_s10 = scalar_lea.hbm %s3730_s13, 512 }
 0xb59   : > { %p3050_p11 = scmp.ne.s32.totalorder %s3611_s20, %s3049_s18  ;;  %p3054_p8 = scmp.lt.u32.totalorder %s3611_s20, %s3730_s13 }
 0xb5a   : > { %p3055_p0 = scmp.lt.u32.totalorder %s3053_s10, %s3049_s18  ;;  %p3057_p10 = scmp.lt.u32.totalorder %s3049_s18, %s3611_s20 }
 0xb5b   : > { %p3051_p13 = pnand %p3050_p11, %p3731_p12 }
 0xb5c   : > { %p3056_p2 = por %p3055_p0, %p3054_p8 }
 0xb5d   : > { %p3052_p3 = pneg %p3051_p13 }
 0xb5e   : > { %p3058_p1 = por %p3057_p10, %p3056_p2 }
 0xb60   : > { %p3059_p4 = pnand %p3058_p1, %p3052_p3 }
 0xb62   : > { %3062 = shalt.err (!%p3059_p4)
}
 0xb63   : > { %2790 = dma.vmem_to_hbm [thread:$0]  (%p3731_p12), %s3613_s25, 128, %s3611_s20, %s2373_s28  }
 0xb64 PF: > { %s3732_s14 = sld [smem:[#allocation21_spill]]  ;;  %s3733_s17 = sld [smem:[#allocation17_spill]] }
 0xb65   : > { %s3734_s19 = sld [smem:[#allocation25_spill]] }
 0xb6a   : > { %p2817_p5 = scmp.ge.s32.totalorder %s3732_s14, 2  ;;  %s2400_s6 = sand.u32 1, %s3733_s17  }
 0xb6b   : > { %p3735_p6 = scmp.ne.s32.totalorder %s3734_s19, 0  ;;  %s2401_s11 = scalar_lea.sflag [#allocation6], %s2400_s6 }
 0xb6d   : > { %p2806_p7 = pnand %p2817_p5, %p3735_p6 }
 0xb6f   : > { %3108 = dma.done.wait (!%p2806_p7), %s2401_s11, 128  }
 0xb70   : > { %3110 = vsyncadd (!%p2806_p7), %s2401_s11, 4294967168  ;;  %s29_s15 = sadd.s32 1, %s3732_s14   ;;  %s3736_s12 = sld [smem:[#allocation18_spill]] }
 0xb71   : > { %p26_p9 = scmp.ge.s32.totalorder %s29_s15, 6   ;;  %s3737_s27 = sld [smem:[#allocation26_spill]] }
 0xb72   : > { %s3738_s28 = sld [smem:[#allocation19_spill]]  ;;  %s3739_s29 = sld [smem:[#allocation20_spill]] }
 0xb73   : > { %s3740_s30 = sld [smem:[#allocation22_spill]]  ;;  %s3741_s14 = sld [smem:[#allocation24_spill]] }
 0xb74   : > { %s3742_s25 = smov %s3117_s26  ;;  %28 = sbr.rel (!%p26_p9) target bundleno = 15 (0xf), region = 129 }
 0xb76   : > { %s3743_s26 = smov %s3736_s12 }
 0xb7b   :  { %2406 = vsyncpa [#allocation5], 1 }
 0xb7c   :  { %2408 = vsyncpa [#allocation5 + $0x1], 1 }
 0xb7d   :  { %2409 = vsyncpa [#allocation8], 1 }
 0xb7e   :  { %2410 = vsyncpa [#allocation11], 1 }
 0xb7f   :  { %2411 = vsyncpa [#allocation6], 1 }
 0xb80   :  { %2413 = vsyncpa [#allocation6 + $0x1], 1 }

</bundles_post_ra>
